<compile_context>
chip_gen: v6e
topology: v6e:2x2x1
jax: 0.10.0
libtpu: 0.0.40
codegen_flags: <defaults>
</compile_context>

<pallas_src>
import functools
import math

import jax
import jax.numpy as jnp
from jax import lax
from jax.experimental import pallas as pl
from jax.experimental.pallas import tpu as pltpu


def _mha_kernel(xq_ref, xk_ref, xv_ref,
                wq_ref, wk_ref, wv_ref,
                wo_ref, bo_ref,
                out_ref,
                *, heads, head_dim):
    # Per-grid-step slab of token groups: (G, T, C)
    G, T, C = xq_ref.shape
    D = heads * head_dim

    xq = xq_ref[...]
    xk = xk_ref[...]
    xv = xv_ref[...]

    wq = wq_ref[...]          # (C, D), 1/sqrt(Dh) already folded in
    wk = wk_ref[...]          # (C, D)
    wv = wv_ref[...]          # (C, D)
    wo = wo_ref[...]          # (D, C)

    # Batched matmul dim-numbers: (g, t, c) x (g, c, d) -> (g, t, d)
    dn_proj = (((2,), (1,)), ((0,), (0,)))
    # Scores: (g, t, d) x (g, s, d) -> (g, t, s)   (contract last dims)
    dn_score = (((2,), (2,)), ((0,), (0,)))

    # QKV projections for all G groups in one MXU call each
    # (weights broadcast over the group batch dim, hoisted out of any loop).
    wq_b = jnp.broadcast_to(wq, (G, C, D))
    wk_b = jnp.broadcast_to(wk, (G, C, D))
    wv_b = jnp.broadcast_to(wv, (G, C, D))

    q = lax.dot_general(xq, wq_b, dn_proj, preferred_element_type=jnp.float32)  # (G,T,D)
    k = lax.dot_general(xk, wk_b, dn_proj, preferred_element_type=jnp.float32)  # (G,T,D)
    v = lax.dot_general(xv, wv_b, dn_proj, preferred_element_type=jnp.float32)  # (G,T,D)

    # Per-head attention with the output projection accumulated per head
    # (no concat).  heads is small -> static unrolled loop.
    acc = jnp.zeros((G, T, C), jnp.float32)
    for h in range(heads):
        lo = h * head_dim
        hi = lo + head_dim
        q_h = q[:, :, lo:hi]                                   # (G, T, Dh)
        k_h = k[:, :, lo:hi]                                   # (G, T, Dh)
        v_h = v[:, :, lo:hi]                                   # (G, T, Dh)

        s = lax.dot_general(q_h, k_h, dn_score,
                            preferred_element_type=jnp.float32)  # (G, T, T)
        s_max = jnp.max(s, axis=-1, keepdims=True)
        p = jnp.exp(s - s_max)
        denom = jnp.sum(p, axis=-1, keepdims=True)
        attn = p * pl.reciprocal(denom, approx=True)

        ctx_h = lax.dot_general(attn, v_h, dn_proj,
                                preferred_element_type=jnp.float32)  # (G, T, Dh)

        # Fused "concat + fc_out": out += ctx_h @ W_out[lo:hi, :]
        wo_h = jnp.broadcast_to(wo[lo:hi, :], (G, head_dim, C))
        acc = acc + lax.dot_general(ctx_h, wo_h, dn_proj,
                                    preferred_element_type=jnp.float32)  # (G, T, C)

    out_ref[...] = (acc + bo_ref[...]).astype(out_ref.dtype)


def multi_head_attention(input_q, input_k, input_v,
                         w_q, w_k, w_v, w_out, b_out,
                         *, heads):
    """Pallas implementation of TMultiHeadAttention.forward.

    input_q/k/v: [B, N, T, C] float32
    w_q/w_k/w_v: [C, heads*head_dim]   (pre-transposed torch Linear weights)
    w_out:       [heads*head_dim, C]
    b_out:       [C]
    returns:     [B, N, T, C]
    """
    B, N, T, C = input_q.shape
    hd_total = w_q.shape[1]
    head_dim = hd_total // heads
    BN = B * N

    # Two "parallel" grid steps when possible (keeps both v7x TensorCores
    # busy and cuts per-step overhead 4x vs. a grid of B*N); otherwise 1.
    num_steps = 2 if (BN % 2 == 0 and BN >= 2) else 1
    G = BN // num_steps

    xq = input_q.reshape(BN, T, C)
    xk = input_k.reshape(BN, T, C)
    xv = input_v.reshape(BN, T, C)

    # Fold the 1/sqrt(head_dim) attention scale into W_Q (host side, free).
    w_q_scaled = (w_q * (1.0 / math.sqrt(head_dim))).astype(w_q.dtype)
    b2 = b_out.reshape(1, C)

    x_spec = pl.BlockSpec((G, T, C), lambda i: (i, 0, 0))
    out_spec = pl.BlockSpec((G, T, C), lambda i: (i, 0, 0))
    # Weights / bias: tiny, identical for every step -> keep the full arrays
    # resident in VMEM once, untiled (no pipeline double-buffering).
    w_spec = pl.BlockSpec(memory_space=pltpu.MemorySpace.VMEM)

    kernel = functools.partial(_mha_kernel, heads=heads, head_dim=head_dim)

    out = pl.pallas_call(
        kernel,
        out_shape=jax.ShapeDtypeStruct((BN, T, C), jnp.float32),
        grid_spec=pltpu.PrefetchScalarGridSpec(
            num_scalar_prefetch=0,
            grid=(num_steps,),
            in_specs=[x_spec, x_spec, x_spec,
                      w_spec, w_spec, w_spec,
                      w_spec, w_spec],
            out_specs=out_spec,
        ),
        compiler_params=pltpu.CompilerParams(
            dimension_semantics=("parallel",)),
    )(xq, xk, xv, w_q_scaled, w_k, w_v, w_out, b2)

    return out.reshape(B, N, T, C)


def _reference(input_q, input_k, input_v, w_q, w_k, w_v, w_out, b_out, *, heads):
    """Pure-JAX reference mirroring the PyTorch module."""
    B, N, T, C = input_q.shape
    head_dim = w_q.shape[1] // heads

    def proj(x, w):
        y = jnp.einsum("bntc,cd->bntd", x, w)
        y = y.reshape(B, N, T, heads, head_dim)
        return jnp.transpose(y, (0, 3, 1, 2, 4))  # [B, H, N, T, Dh]

    Q = proj(input_q, w_q)
    K = proj(input_k, w_k)
    V = proj(input_v, w_v)

    scores = jnp.einsum("bhntd,bhnsd->bhnts", Q, K) / jnp.sqrt(jnp.float32(head_dim))
    attn = jax.nn.softmax(scores, axis=-1)
    ctx = jnp.einsum("bhnts,bhnsd->bhntd", attn, V)
    ctx = jnp.transpose(ctx, (0, 2, 3, 1, 4)).reshape(B, N, T, heads * head_dim)
    return jnp.einsum("bntd,dc->bntc", ctx, w_out) + b_out


if __name__ == "__main__":
    # Small shapes consistent with the module: [B, N, T, C], T=12.
    B, N, T = 2, 4, 12
    embed_size, heads = 32, 4
    head_dim = embed_size // heads

    key = jax.random.PRNGKey(0)
    k_xq, k_xk, k_xv, k_wq, k_wk, k_wv, k_wo, k_bo = jax.random.split(key, 8)

    input_q = jax.random.normal(k_xq, (B, N, T, embed_size), dtype=jnp.float32)
    input_k = jax.random.normal(k_xk, (B, N, T, embed_size), dtype=jnp.float32)
    input_v = jax.random.normal(k_xv, (B, N, T, embed_size), dtype=jnp.float32)

    # Deterministic parameters (torch Linear weight is [out, in]; we store the
    # transpose [in, out] so the kernel computes x @ W).
    scale = 1.0 / math.sqrt(embed_size)
    w_q = jax.random.uniform(k_wq, (embed_size, heads * head_dim),
                             dtype=jnp.float32, minval=-scale, maxval=scale)
    w_k = jax.random.uniform(k_wk, (embed_size, heads * head_dim),
                             dtype=jnp.float32, minval=-scale, maxval=scale)
    w_v = jax.random.uniform(k_wv, (embed_size, heads * head_dim),
                             dtype=jnp.float32, minval=-scale, maxval=scale)
    w_out = jax.random.uniform(k_wo, (heads * head_dim, embed_size),
                               dtype=jnp.float32, minval=-scale, maxval=scale)
    b_out = jax.random.uniform(k_bo, (embed_size,),
                               dtype=jnp.float32, minval=-scale, maxval=scale)

    out = multi_head_attention(input_q, input_k, input_v,
                               w_q, w_k, w_v, w_out, b_out, heads=heads)
    out = jax.block_until_ready(out)

    ref = _reference(input_q, input_k, input_v,
                     w_q, w_k, w_v, w_out, b_out, heads=heads)
    ref = jax.block_until_ready(ref)

    assert out.shape == (B, N, T, embed_size)
    # Slightly relaxed tolerance: softmax denom uses the EUP approximate
    # reciprocal (~2^-12 relative error), everything else is f32 exact-path.
    assert jnp.allclose(out, ref, atol=2e-3, rtol=2e-3), "mismatch vs reference"
    print("KERNEL_OK")
</pallas_src>

<mosaic_0001>
module attributes {stable_mosaic.version = 11 : i64} {
  func.func @_mha_kernel(%arg0: i32, %arg1: memref<4x12x32xf32, #tpu.memory_space<vmem>>, %arg2: memref<4x12x32xf32, #tpu.memory_space<vmem>>, %arg3: memref<4x12x32xf32, #tpu.memory_space<vmem>>, %arg4: memref<32x32xf32, #tpu.memory_space<vmem>>, %arg5: memref<32x32xf32, #tpu.memory_space<vmem>>, %arg6: memref<32x32xf32, #tpu.memory_space<vmem>>, %arg7: memref<32x32xf32, #tpu.memory_space<vmem>>, %arg8: memref<1x32xf32, #tpu.memory_space<vmem>>, %arg9: memref<4x12x32xf32, #tpu.memory_space<vmem>>) attributes {dimension_semantics = [#tpu.dimension_semantics<parallel>], iteration_bounds = array<i64: 2>, scalar_prefetch = 0 : i64, scratch_operands = 0 : i64, tpu.core_type = #tpu.core_type<tc>, window_params = [{transform_indices = @transform_0, window_bounds = array<i64: 4, 12, 32>}, {transform_indices = @transform_1, window_bounds = array<i64: 4, 12, 32>}, {transform_indices = @transform_2, window_bounds = array<i64: 4, 12, 32>}, {pipeline_mode = #tpu.pipeline_mode<synchronous>, transform_indices = @transform_3, window_bounds = array<i64: 32, 32>}, {pipeline_mode = #tpu.pipeline_mode<synchronous>, transform_indices = @transform_4, window_bounds = array<i64: 32, 32>}, {pipeline_mode = #tpu.pipeline_mode<synchronous>, transform_indices = @transform_5, window_bounds = array<i64: 32, 32>}, {pipeline_mode = #tpu.pipeline_mode<synchronous>, transform_indices = @transform_6, window_bounds = array<i64: 32, 32>}, {pipeline_mode = #tpu.pipeline_mode<synchronous>, transform_indices = @transform_7, window_bounds = array<i64: 1, 32>}, {transform_indices = @transform_8, window_bounds = array<i64: 4, 12, 32>}]} {
    %c0 = arith.constant 0 : index
    %c0_0 = arith.constant 0 : index
    %c0_1 = arith.constant 0 : index
    %0 = vector.load %arg1[%c0, %c0_0, %c0_1] : memref<4x12x32xf32, #tpu.memory_space<vmem>>, vector<4x12x32xf32>
    %c0_2 = arith.constant 0 : index
    %c0_3 = arith.constant 0 : index
    %c0_4 = arith.constant 0 : index
    %1 = vector.load %arg2[%c0_2, %c0_3, %c0_4] : memref<4x12x32xf32, #tpu.memory_space<vmem>>, vector<4x12x32xf32>
    %c0_5 = arith.constant 0 : index
    %c0_6 = arith.constant 0 : index
    %c0_7 = arith.constant 0 : index
    %2 = vector.load %arg3[%c0_5, %c0_6, %c0_7] : memref<4x12x32xf32, #tpu.memory_space<vmem>>, vector<4x12x32xf32>
    %c0_8 = arith.constant 0 : index
    %c0_9 = arith.constant 0 : index
    %3 = vector.load %arg4[%c0_8, %c0_9] : memref<32x32xf32, #tpu.memory_space<vmem>>, vector<32x32xf32>
    %c0_10 = arith.constant 0 : index
    %c0_11 = arith.constant 0 : index
    %4 = vector.load %arg5[%c0_10, %c0_11] : memref<32x32xf32, #tpu.memory_space<vmem>>, vector<32x32xf32>
    %c0_12 = arith.constant 0 : index
    %c0_13 = arith.constant 0 : index
    %5 = vector.load %arg6[%c0_12, %c0_13] : memref<32x32xf32, #tpu.memory_space<vmem>>, vector<32x32xf32>
    %c0_14 = arith.constant 0 : index
    %c0_15 = arith.constant 0 : index
    %6 = vector.load %arg7[%c0_14, %c0_15] : memref<32x32xf32, #tpu.memory_space<vmem>>, vector<32x32xf32>
    %7 = vector.shape_cast %3 : vector<32x32xf32> to vector<1x32x32xf32>
    %8 = vector.broadcast %7 : vector<1x32x32xf32> to vector<4x32x32xf32>
    %9 = vector.shape_cast %4 : vector<32x32xf32> to vector<1x32x32xf32>
    %10 = vector.broadcast %9 : vector<1x32x32xf32> to vector<4x32x32xf32>
    %11 = vector.shape_cast %5 : vector<32x32xf32> to vector<1x32x32xf32>
    %12 = vector.broadcast %11 : vector<1x32x32xf32> to vector<4x32x32xf32>
    %cst = arith.constant dense<0.000000e+00> : vector<4x12x32xf32>
    %13 = tpu.matmul %0, %8, %cst {dimension_numbers = #tpu.dot_dimension_numbers<[2], [1], [1], [2], [0, 0, 0, 1, 1, 2], [0], [0]>} : vector<4x12x32xf32>, vector<4x32x32xf32>, vector<4x12x32xf32> -> vector<4x12x32xf32>
    %cst_16 = arith.constant dense<0.000000e+00> : vector<4x12x32xf32>
    %14 = tpu.matmul %1, %10, %cst_16 {dimension_numbers = #tpu.dot_dimension_numbers<[2], [1], [1], [2], [0, 0, 0, 1, 1, 2], [0], [0]>} : vector<4x12x32xf32>, vector<4x32x32xf32>, vector<4x12x32xf32> -> vector<4x12x32xf32>
    %cst_17 = arith.constant dense<0.000000e+00> : vector<4x12x32xf32>
    %15 = tpu.matmul %2, %12, %cst_17 {dimension_numbers = #tpu.dot_dimension_numbers<[2], [1], [1], [2], [0, 0, 0, 1, 1, 2], [0], [0]>} : vector<4x12x32xf32>, vector<4x32x32xf32>, vector<4x12x32xf32> -> vector<4x12x32xf32>
    %cst_18 = arith.constant 0.000000e+00 : f32
    %16 = vector.broadcast %cst_18 : f32 to vector<4x12x32xf32>
    %17 = vector.extract_strided_slice %13 {offsets = [0, 0, 0], sizes = [4, 12, 8], strides = [1, 1, 1]} : vector<4x12x32xf32> to vector<4x12x8xf32>
    %18 = vector.extract_strided_slice %14 {offsets = [0, 0, 0], sizes = [4, 12, 8], strides = [1, 1, 1]} : vector<4x12x32xf32> to vector<4x12x8xf32>
    %19 = vector.extract_strided_slice %15 {offsets = [0, 0, 0], sizes = [4, 12, 8], strides = [1, 1, 1]} : vector<4x12x32xf32> to vector<4x12x8xf32>
    %cst_19 = arith.constant dense<0.000000e+00> : vector<4x12x12xf32>
    %20 = tpu.matmul %17, %18, %cst_19 {dimension_numbers = #tpu.dot_dimension_numbers<[2], [2], [1], [1], [0, 0, 0, 1, 1, 1], [0], [0]>} : vector<4x12x8xf32>, vector<4x12x8xf32>, vector<4x12x12xf32> -> vector<4x12x12xf32>
    %cst_20 = arith.constant dense<0xFF800000> : vector<4x12xf32>
    %21 = vector.multi_reduction <maximumf>, %20, %cst_20 [2] : vector<4x12x12xf32> to vector<4x12xf32>
    %22 = vector.shape_cast %21 : vector<4x12xf32> to vector<4x12x1xf32>
    %23 = vector.broadcast %22 : vector<4x12x1xf32> to vector<4x12x12xf32>
    %24 = arith.subf %20, %23 : vector<4x12x12xf32>
    %25 = math.exp %24 : vector<4x12x12xf32>
    %cst_21 = arith.constant dense<0.000000e+00> : vector<4x12xf32>
    %26 = vector.multi_reduction <add>, %25, %cst_21 [2] : vector<4x12x12xf32> to vector<4x12xf32>
    %27 = vector.shape_cast %26 : vector<4x12xf32> to vector<4x12x1xf32>
    %28 = tpu.reciprocal %27 {approx = true} : vector<4x12x1xf32> -> vector<4x12x1xf32>
    %29 = vector.broadcast %28 : vector<4x12x1xf32> to vector<4x12x12xf32>
    %30 = arith.mulf %25, %29 : vector<4x12x12xf32>
    %cst_22 = arith.constant dense<0.000000e+00> : vector<4x12x8xf32>
    %31 = tpu.matmul %30, %19, %cst_22 {dimension_numbers = #tpu.dot_dimension_numbers<[2], [1], [1], [2], [0, 0, 0, 1, 1, 2], [0], [0]>} : vector<4x12x12xf32>, vector<4x12x8xf32>, vector<4x12x8xf32> -> vector<4x12x8xf32>
    %32 = vector.extract_strided_slice %6 {offsets = [0, 0], sizes = [8, 32], strides = [1, 1]} : vector<32x32xf32> to vector<8x32xf32>
    %33 = vector.shape_cast %32 : vector<8x32xf32> to vector<1x8x32xf32>
    %34 = vector.broadcast %33 : vector<1x8x32xf32> to vector<4x8x32xf32>
    %cst_23 = arith.constant dense<0.000000e+00> : vector<4x12x32xf32>
    %35 = tpu.matmul %31, %34, %cst_23 {dimension_numbers = #tpu.dot_dimension_numbers<[2], [1], [1], [2], [0, 0, 0, 1, 1, 2], [0], [0]>} : vector<4x12x8xf32>, vector<4x8x32xf32>, vector<4x12x32xf32> -> vector<4x12x32xf32>
    %36 = arith.addf %16, %35 : vector<4x12x32xf32>
    %37 = vector.extract_strided_slice %13 {offsets = [0, 0, 8], sizes = [4, 12, 8], strides = [1, 1, 1]} : vector<4x12x32xf32> to vector<4x12x8xf32>
    %38 = vector.extract_strided_slice %14 {offsets = [0, 0, 8], sizes = [4, 12, 8], strides = [1, 1, 1]} : vector<4x12x32xf32> to vector<4x12x8xf32>
    %39 = vector.extract_strided_slice %15 {offsets = [0, 0, 8], sizes = [4, 12, 8], strides = [1, 1, 1]} : vector<4x12x32xf32> to vector<4x12x8xf32>
    %cst_24 = arith.constant dense<0.000000e+00> : vector<4x12x12xf32>
    %40 = tpu.matmul %37, %38, %cst_24 {dimension_numbers = #tpu.dot_dimension_numbers<[2], [2], [1], [1], [0, 0, 0, 1, 1, 1], [0], [0]>} : vector<4x12x8xf32>, vector<4x12x8xf32>, vector<4x12x12xf32> -> vector<4x12x12xf32>
    %cst_25 = arith.constant dense<0xFF800000> : vector<4x12xf32>
    %41 = vector.multi_reduction <maximumf>, %40, %cst_25 [2] : vector<4x12x12xf32> to vector<4x12xf32>
    %42 = vector.shape_cast %41 : vector<4x12xf32> to vector<4x12x1xf32>
    %43 = vector.broadcast %42 : vector<4x12x1xf32> to vector<4x12x12xf32>
    %44 = arith.subf %40, %43 : vector<4x12x12xf32>
    %45 = math.exp %44 : vector<4x12x12xf32>
    %cst_26 = arith.constant dense<0.000000e+00> : vector<4x12xf32>
    %46 = vector.multi_reduction <add>, %45, %cst_26 [2] : vector<4x12x12xf32> to vector<4x12xf32>
    %47 = vector.shape_cast %46 : vector<4x12xf32> to vector<4x12x1xf32>
    %48 = tpu.reciprocal %47 {approx = true} : vector<4x12x1xf32> -> vector<4x12x1xf32>
    %49 = vector.broadcast %48 : vector<4x12x1xf32> to vector<4x12x12xf32>
    %50 = arith.mulf %45, %49 : vector<4x12x12xf32>
    %cst_27 = arith.constant dense<0.000000e+00> : vector<4x12x8xf32>
    %51 = tpu.matmul %50, %39, %cst_27 {dimension_numbers = #tpu.dot_dimension_numbers<[2], [1], [1], [2], [0, 0, 0, 1, 1, 2], [0], [0]>} : vector<4x12x12xf32>, vector<4x12x8xf32>, vector<4x12x8xf32> -> vector<4x12x8xf32>
    %52 = vector.extract_strided_slice %6 {offsets = [8, 0], sizes = [8, 32], strides = [1, 1]} : vector<32x32xf32> to vector<8x32xf32>
    %53 = vector.shape_cast %52 : vector<8x32xf32> to vector<1x8x32xf32>
    %54 = vector.broadcast %53 : vector<1x8x32xf32> to vector<4x8x32xf32>
    %cst_28 = arith.constant dense<0.000000e+00> : vector<4x12x32xf32>
    %55 = tpu.matmul %51, %54, %cst_28 {dimension_numbers = #tpu.dot_dimension_numbers<[2], [1], [1], [2], [0, 0, 0, 1, 1, 2], [0], [0]>} : vector<4x12x8xf32>, vector<4x8x32xf32>, vector<4x12x32xf32> -> vector<4x12x32xf32>
    %56 = arith.addf %36, %55 : vector<4x12x32xf32>
    %57 = vector.extract_strided_slice %13 {offsets = [0, 0, 16], sizes = [4, 12, 8], strides = [1, 1, 1]} : vector<4x12x32xf32> to vector<4x12x8xf32>
    %58 = vector.extract_strided_slice %14 {offsets = [0, 0, 16], sizes = [4, 12, 8], strides = [1, 1, 1]} : vector<4x12x32xf32> to vector<4x12x8xf32>
    %59 = vector.extract_strided_slice %15 {offsets = [0, 0, 16], sizes = [4, 12, 8], strides = [1, 1, 1]} : vector<4x12x32xf32> to vector<4x12x8xf32>
    %cst_29 = arith.constant dense<0.000000e+00> : vector<4x12x12xf32>
    %60 = tpu.matmul %57, %58, %cst_29 {dimension_numbers = #tpu.dot_dimension_numbers<[2], [2], [1], [1], [0, 0, 0, 1, 1, 1], [0], [0]>} : vector<4x12x8xf32>, vector<4x12x8xf32>, vector<4x12x12xf32> -> vector<4x12x12xf32>
    %cst_30 = arith.constant dense<0xFF800000> : vector<4x12xf32>
    %61 = vector.multi_reduction <maximumf>, %60, %cst_30 [2] : vector<4x12x12xf32> to vector<4x12xf32>
    %62 = vector.shape_cast %61 : vector<4x12xf32> to vector<4x12x1xf32>
    %63 = vector.broadcast %62 : vector<4x12x1xf32> to vector<4x12x12xf32>
    %64 = arith.subf %60, %63 : vector<4x12x12xf32>
    %65 = math.exp %64 : vector<4x12x12xf32>
    %cst_31 = arith.constant dense<0.000000e+00> : vector<4x12xf32>
    %66 = vector.multi_reduction <add>, %65, %cst_31 [2] : vector<4x12x12xf32> to vector<4x12xf32>
    %67 = vector.shape_cast %66 : vector<4x12xf32> to vector<4x12x1xf32>
    %68 = tpu.reciprocal %67 {approx = true} : vector<4x12x1xf32> -> vector<4x12x1xf32>
    %69 = vector.broadcast %68 : vector<4x12x1xf32> to vector<4x12x12xf32>
    %70 = arith.mulf %65, %69 : vector<4x12x12xf32>
    %cst_32 = arith.constant dense<0.000000e+00> : vector<4x12x8xf32>
    %71 = tpu.matmul %70, %59, %cst_32 {dimension_numbers = #tpu.dot_dimension_numbers<[2], [1], [1], [2], [0, 0, 0, 1, 1, 2], [0], [0]>} : vector<4x12x12xf32>, vector<4x12x8xf32>, vector<4x12x8xf32> -> vector<4x12x8xf32>
    %72 = vector.extract_strided_slice %6 {offsets = [16, 0], sizes = [8, 32], strides = [1, 1]} : vector<32x32xf32> to vector<8x32xf32>
    %73 = vector.shape_cast %72 : vector<8x32xf32> to vector<1x8x32xf32>
    %74 = vector.broadcast %73 : vector<1x8x32xf32> to vector<4x8x32xf32>
    %cst_33 = arith.constant dense<0.000000e+00> : vector<4x12x32xf32>
    %75 = tpu.matmul %71, %74, %cst_33 {dimension_numbers = #tpu.dot_dimension_numbers<[2], [1], [1], [2], [0, 0, 0, 1, 1, 2], [0], [0]>} : vector<4x12x8xf32>, vector<4x8x32xf32>, vector<4x12x32xf32> -> vector<4x12x32xf32>
    %76 = arith.addf %56, %75 : vector<4x12x32xf32>
    %77 = vector.extract_strided_slice %13 {offsets = [0, 0, 24], sizes = [4, 12, 8], strides = [1, 1, 1]} : vector<4x12x32xf32> to vector<4x12x8xf32>
    %78 = vector.extract_strided_slice %14 {offsets = [0, 0, 24], sizes = [4, 12, 8], strides = [1, 1, 1]} : vector<4x12x32xf32> to vector<4x12x8xf32>
    %79 = vector.extract_strided_slice %15 {offsets = [0, 0, 24], sizes = [4, 12, 8], strides = [1, 1, 1]} : vector<4x12x32xf32> to vector<4x12x8xf32>
    %cst_34 = arith.constant dense<0.000000e+00> : vector<4x12x12xf32>
    %80 = tpu.matmul %77, %78, %cst_34 {dimension_numbers = #tpu.dot_dimension_numbers<[2], [2], [1], [1], [0, 0, 0, 1, 1, 1], [0], [0]>} : vector<4x12x8xf32>, vector<4x12x8xf32>, vector<4x12x12xf32> -> vector<4x12x12xf32>
    %cst_35 = arith.constant dense<0xFF800000> : vector<4x12xf32>
    %81 = vector.multi_reduction <maximumf>, %80, %cst_35 [2] : vector<4x12x12xf32> to vector<4x12xf32>
    %82 = vector.shape_cast %81 : vector<4x12xf32> to vector<4x12x1xf32>
    %83 = vector.broadcast %82 : vector<4x12x1xf32> to vector<4x12x12xf32>
    %84 = arith.subf %80, %83 : vector<4x12x12xf32>
    %85 = math.exp %84 : vector<4x12x12xf32>
    %cst_36 = arith.constant dense<0.000000e+00> : vector<4x12xf32>
    %86 = vector.multi_reduction <add>, %85, %cst_36 [2] : vector<4x12x12xf32> to vector<4x12xf32>
    %87 = vector.shape_cast %86 : vector<4x12xf32> to vector<4x12x1xf32>
    %88 = tpu.reciprocal %87 {approx = true} : vector<4x12x1xf32> -> vector<4x12x1xf32>
    %89 = vector.broadcast %88 : vector<4x12x1xf32> to vector<4x12x12xf32>
    %90 = arith.mulf %85, %89 : vector<4x12x12xf32>
    %cst_37 = arith.constant dense<0.000000e+00> : vector<4x12x8xf32>
    %91 = tpu.matmul %90, %79, %cst_37 {dimension_numbers = #tpu.dot_dimension_numbers<[2], [1], [1], [2], [0, 0, 0, 1, 1, 2], [0], [0]>} : vector<4x12x12xf32>, vector<4x12x8xf32>, vector<4x12x8xf32> -> vector<4x12x8xf32>
    %92 = vector.extract_strided_slice %6 {offsets = [24, 0], sizes = [8, 32], strides = [1, 1]} : vector<32x32xf32> to vector<8x32xf32>
    %93 = vector.shape_cast %92 : vector<8x32xf32> to vector<1x8x32xf32>
    %94 = vector.broadcast %93 : vector<1x8x32xf32> to vector<4x8x32xf32>
    %cst_38 = arith.constant dense<0.000000e+00> : vector<4x12x32xf32>
    %95 = tpu.matmul %91, %94, %cst_38 {dimension_numbers = #tpu.dot_dimension_numbers<[2], [1], [1], [2], [0, 0, 0, 1, 1, 2], [0], [0]>} : vector<4x12x8xf32>, vector<4x8x32xf32>, vector<4x12x32xf32> -> vector<4x12x32xf32>
    %96 = arith.addf %76, %95 : vector<4x12x32xf32>
    %c0_39 = arith.constant 0 : index
    %c0_40 = arith.constant 0 : index
    %97 = vector.load %arg8[%c0_39, %c0_40] : memref<1x32xf32, #tpu.memory_space<vmem>>, vector<1x32xf32>
    %98 = vector.shape_cast %97 : vector<1x32xf32> to vector<1x1x32xf32>
    %99 = vector.broadcast %98 : vector<1x1x32xf32> to vector<4x12x32xf32>
    %100 = arith.addf %96, %99 : vector<4x12x32xf32>
    %c0_41 = arith.constant 0 : index
    %c0_42 = arith.constant 0 : index
    %c0_43 = arith.constant 0 : index
    %101 = vector.load %arg9[%c0_41, %c0_42, %c0_43] : memref<4x12x32xf32, #tpu.memory_space<vmem>>, vector<4x12x32xf32>
    tpu.vector_store %arg9[%c0_41, %c0_42, %c0_43], %100 {strides = array<i32>} : memref<4x12x32xf32, #tpu.memory_space<vmem>>, vector<4x12x32xf32>,
    return
  }
  func.func @transform_0(%arg0: i32) -> (i32, i32, i32) {
    %c0_i32 = arith.constant 0 : i32
    %c0_i32_0 = arith.constant 0 : i32
    %c0_i32_1 = arith.constant 0 : i32
    return %arg0, %c0_i32, %c0_i32_0 : i32, i32, i32
  }
  func.func @transform_1(%arg0: i32) -> (i32, i32, i32) {
    %c0_i32 = arith.constant 0 : i32
    %c0_i32_0 = arith.constant 0 : i32
    %c0_i32_1 = arith.constant 0 : i32
    return %arg0, %c0_i32, %c0_i32_0 : i32, i32, i32
  }
  func.func @transform_2(%arg0: i32) -> (i32, i32, i32) {
    %c0_i32 = arith.constant 0 : i32
    %c0_i32_0 = arith.constant 0 : i32
    %c0_i32_1 = arith.constant 0 : i32
    return %arg0, %c0_i32, %c0_i32_0 : i32, i32, i32
  }
  func.func @transform_3(%arg0: i32) -> (i32, i32) {
    %c0_i32 = arith.constant 0 : i32
    %c0_i32_0 = arith.constant 0 : i32
    %c0_i32_1 = arith.constant 0 : i32
    return %c0_i32, %c0_i32_0 : i32, i32
  }
  func.func @transform_4(%arg0: i32) -> (i32, i32) {
    %c0_i32 = arith.constant 0 : i32
    %c0_i32_0 = arith.constant 0 : i32
    %c0_i32_1 = arith.constant 0 : i32
    return %c0_i32, %c0_i32_0 : i32, i32
  }
  func.func @transform_5(%arg0: i32) -> (i32, i32) {
    %c0_i32 = arith.constant 0 : i32
    %c0_i32_0 = arith.constant 0 : i32
    %c0_i32_1 = arith.constant 0 : i32
    return %c0_i32, %c0_i32_0 : i32, i32
  }
  func.func @transform_6(%arg0: i32) -> (i32, i32) {
    %c0_i32 = arith.constant 0 : i32
    %c0_i32_0 = arith.constant 0 : i32
    %c0_i32_1 = arith.constant 0 : i32
    return %c0_i32, %c0_i32_0 : i32, i32
  }
  func.func @transform_7(%arg0: i32) -> (i32, i32) {
    %c0_i32 = arith.constant 0 : i32
    %c0_i32_0 = arith.constant 0 : i32
    %c0_i32_1 = arith.constant 0 : i32
    return %c0_i32, %c0_i32_0 : i32, i32
  }
  func.func @transform_8(%arg0: i32) -> (i32, i32, i32) {
    %c0_i32 = arith.constant 0 : i32
    %c0_i32_0 = arith.constant 0 : i32
    %c0_i32_1 = arith.constant 0 : i32
    return %arg0, %c0_i32, %c0_i32_0 : i32, i32, i32
  }
}

</mosaic_0001>

<bundles_post_ra>
// kernel: tpu_custom_call.1
= control target key start
LH: loop header
LB: loop body
LE: loop exit
PB: predicated region body
PF: predicated region fallthrough
CT: control target
= control target key end

     0   :  { %s7058_s27 = smov 0   ;;  %s7862_s0 = inlined_call_operand.vmem [shape: f32[8,12,32], index: 0, kind: input, shape index: {}]   ;;  %s7863_s1 = inlined_call_operand.vmem [shape: f32[8,12,32], index: 1, kind: input, shape index: {}]   ;;  %s7864_s2 = inlined_call_operand.vmem [shape: f32[8,12,32], index: 2, kind: input, shape index: {}]   ;;  %s7865_s3 = inlined_call_operand.vmem [shape: f32[32,32], index: 3, kind: input, shape index: {}]   ;;  %s7866_s4 = inlined_call_operand.vmem [shape: f32[32,32], index: 4, kind: input, shape index: {}]   ;;  %s7867_s5 = inlined_call_operand.vmem [shape: f32[32,32], index: 5, kind: input, shape index: {}]   ;;  %s7868_s6 = inlined_call_operand.vmem [shape: f32[32,32], index: 6, kind: input, shape index: {}]   ;;  %s7869_s7 = inlined_call_operand.vmem [shape: f32[1,32], index: 7, kind: input, shape index: {}]   ;;  %s7870_s8 = inlined_call_operand.vmem [shape: f32[8,12,32], index: 8, kind: output, shape index: {}]  }
   0x1 LB: > { %s5987_s28 = sadd.s32 4294967295, %s7008_s27   ;;  %p5991_p0 = scmp.ge.s32.totalorder %s7008_s27, 1  ;;  %s7008_s27 = sphi %s7058_s27, %s18_s27  }
   0x2   : > { %p288_p1 = scmp.lt.s32.totalorder %s7008_s27, 3 }
   0x4   : > { %p289_p2 = pnand %p5991_p0, %p288_p1 }
   0x5   : > { %s5992_s11 = sshll.u32 (!%p289_p2), %s5987_s28, 2  ;;  %s7010_s22 = smov (!%p289_p2), 120  }
   0x6   : > { %292 = sbr.rel (%p289_p2) target bundleno = 3153 (0xc51), region = 52  ;;  %p337_p3 = scmp.lt.s32.totalorder (!%p289_p2), %s5992_s11, 7 }
   0x7   : > { %s7011_s23 = smov (!%p289_p2), 112  }
   0xb   : > { %v391_v0 = vld [vmem:[%s7865_s3 + $0x18] sm:$0xff]  ;;  %v390_v1 = vld [vmem:[%s7865_s3 + $0x10] sm:$0xff]  ;;  %v389_v2 = vld [vmem:[%s7865_s3 + $0x8] sm:$0xff]  ;;  %s7872_s11 = smov (!%p337_p3, %s5992_s11), 7  ;;  %vm404_vm0 = vcmask 261120   ;;  %vm1377_vm1 = vcmask 64512  }
   0xc   : > { %6427 = vmatprep.subr.mxu0 %v391_v0  ;;  %6438 = vmatprep.subr.mxu1 %v391_v0  ;;  %v388_v3 = vld [vmem:[%s7865_s3] sm:$0xff]  ;;  %s7078_s16 = sshll.u32 %s7872_s11, 4  ;;  %v395_v11 = vld [vmem:[%s7866_s4 + $0x18] sm:$0xff]  ;;  %v394_v13 = vld [vmem:[%s7866_s4 + $0x10] sm:$0xff]  ;;  %vm1822_vm2 = vcmask 1043456   ;;  %vm1730_vm3 = vcmask 93184  }
   0xd   : > { %6428 = vmatpush3.msra.mxu0 %v391_v0  ;;  %6439 = vmatpush3.msra.mxu1 %v391_v0  ;;  %s7084_s19 = scalar_lea.vmem %s7862_s0, %s7078_s16  ;;  %v393_v14 = vld [vmem:[%s7866_s4 + $0x8] sm:$0xff]  ;;  %s7115_s29 = scalar_lea.vmem %s7863_s1, %s7078_s16  ;;  %v392_v15 = vld [vmem:[%s7866_s4] sm:$0xff]  ;;  %v399_v24 = vld [vmem:[%s7867_s5 + $0x18] sm:$0xff]  ;;  %vm1726_vm4 = vcmask 97280   ;;  %vm5897_vm5 = vcmask 257024  }
   0xe   : > { %6429 = vmatprep.subr.mxu0 %v390_v1  ;;  %6440 = vmatprep.subr.mxu1 %v390_v1  ;;  %v364_v4 = vld [vmem:[%s7084_s19] sm:$0xff]  ;;  %v365_v5 = vld [vmem:[%s7084_s19 + $0x8] sm:$0xf]  ;;  %v366_v6 = vld [vmem:[%s7084_s19 + $0x10] sm:$0xff]  ;;  %s7146_s17 = scalar_lea.vmem %s7864_s2, %s7078_s16 }
   0xf   : > { %6430 = vmatpush3.msra.mxu0 %v390_v1  ;;  %6441 = vmatpush3.msra.mxu1 %v390_v1  ;;  %v367_v7 = vld [vmem:[%s7084_s19 + $0x18] sm:$0xf]  ;;  %v368_v8 = vld [vmem:[%s7084_s19 + $0x20] sm:$0xff]  ;;  %v369_v9 = vld [vmem:[%s7084_s19 + $0x28] sm:$0xf] }
  0x10   : > { %6431 = vmatprep.subr.mxu0 %v389_v2  ;;  %6442 = vmatprep.subr.mxu1 %v389_v2  ;;  %v370_v10 = vld [vmem:[%s7084_s19 + $0x30] sm:$0xff]  ;;  %v371_v12 = vld [vmem:[%s7084_s19 + $0x38] sm:$0xf]  ;;  %v372_v16 = vld [vmem:[%s7115_s29] sm:$0xff] }
  0x11   : > { %6432 = vmatpush3.msra.mxu0 %v389_v2  ;;  %6443 = vmatpush3.msra.mxu1 %v389_v2  ;;  %v374_v17 = vld [vmem:[%s7115_s29 + $0x10] sm:$0xff]  ;;  %v373_v18 = vld [vmem:[%s7115_s29 + $0x8] sm:$0xf]  ;;  %v375_v19 = vld [vmem:[%s7115_s29 + $0x18] sm:$0xf] }
  0x12   : > { %6433 = vmatprep.subr.mxu0 %v388_v3  ;;  %6444 = vmatprep.subr.mxu1 %v388_v3  ;;  %v376_v20 = vld [vmem:[%s7115_s29 + $0x20] sm:$0xff]  ;;  %v378_v21 = vld [vmem:[%s7115_s29 + $0x30] sm:$0xff]  ;;  %v377_v22 = vld [vmem:[%s7115_s29 + $0x28] sm:$0xf] }
  0x13   : > { %6434 = vmatpush3.msra.mxu0 %v388_v3  ;;  %6435 = vmatprep.mubr.msk.f32.mxu0 %vm404_vm0, %v364_v4  ;;  %v379_v23 = vld [vmem:[%s7115_s29 + $0x38] sm:$0xf]  ;;  %v398_v25 = vld [vmem:[%s7867_s5 + $0x10] sm:$0xff]  ;;  %v397_v26 = vld [vmem:[%s7867_s5 + $0x8] sm:$0xff]  ;;  %s7012_s29 = smov 104  }
  0x14   : > { %6445 = vmatpush3.msra.mxu1 %v388_v3  ;;  %6436 = vmatmul.mubr.msk.f32.vlgmr.msra.gmra.mxu0 %vm404_vm0, %v365_v5  ;;  %v380_v27 = vld [vmem:[%s7146_s17] sm:$0xff]  ;;  %v381_v29 = vld [vmem:[%s7146_s17 + $0x8] sm:$0xf]  ;;  %v382_v30 = vld [vmem:[%s7146_s17 + $0x10] sm:$0xff] }
  0x15   : > { %6446 = vmatprep.mubr.msk.f32.mxu1 %vm404_vm0, %v366_v6  ;;  %6449 = vmatprep.subr.mxu0 %v391_v0  ;;  %v396_v28 = vld [vmem:[%s7867_s5] sm:$0xff]  ;;  %v383_v31 = vld [vmem:[%s7146_s17 + $0x18] sm:$0xf]  ;;  %v385_v33 = vld [vmem:[%s7146_s17 + $0x28] sm:$0xf] }
  0x16   : > { %6460 = vmatprep.subr.mxu1 %v391_v0  ;;  %6447 = vmatmul.mubr.msk.f32.vlgmr.msra.gmra.mxu1 %vm404_vm0, %v367_v7  ;;  %v384_v32 = vld [vmem:[%s7146_s17 + $0x20] sm:$0xff]  ;;  %v386_v34 = vld [vmem:[%s7146_s17 + $0x30] sm:$0xff]  ;;  %v387_v35 = vld [vmem:[%s7146_s17 + $0x38] sm:$0xf]  ;;  %s7834_s17 = scalar_lea.vmem %s7870_s8, %s7078_s16 }
  0x17   : > { %6450 = vmatpush3.msra.mxu0 %v391_v0  ;;  %6461 = vmatpush3.msra.mxu1 %v391_v0 }
  0x18   : > { %6451 = vmatprep.subr.mxu0 %v390_v1  ;;  %6462 = vmatprep.subr.mxu1 %v390_v1 }
  0x19   : > { %6452 = vmatpush3.msra.mxu0 %v390_v1  ;;  %6463 = vmatpush3.msra.mxu1 %v390_v1 }
  0x1a   : > { %6453 = vmatprep.subr.mxu0 %v389_v2  ;;  %6464 = vmatprep.subr.mxu1 %v389_v2 }
  0x1b   : > { %6454 = vmatpush3.msra.mxu0 %v389_v2  ;;  %6465 = vmatpush3.msra.mxu1 %v389_v2 }
  0x1c   : > { %6455 = vmatprep.subr.mxu0 %v388_v3  ;;  %6466 = vmatprep.subr.mxu1 %v388_v3 }
  0x1d   : > { %6456 = vmatpush3.msra.mxu0 %v388_v3  ;;  %6457 = vmatprep.mubr.msk.f32.mxu0 %vm404_vm0, %v368_v8 }
  0x1e   : > { %6467 = vmatpush3.msra.mxu1 %v388_v3  ;;  %6458 = vmatmul.mubr.msk.f32.vlgmr.msra.gmra.mxu0 %vm404_vm0, %v369_v9 }
  0x1f   : > { %6468 = vmatprep.mubr.msk.f32.mxu1 %vm404_vm0, %v370_v10  ;;  %6471 = vmatprep.subr.mxu0 %v395_v11 }
  0x20   : > { %6482 = vmatprep.subr.mxu1 %v395_v11  ;;  %6469 = vmatmul.mubr.msk.f32.vlgmr.msra.gmra.mxu1 %vm404_vm0, %v371_v12 }
  0x21   : > { %6472 = vmatpush3.msra.mxu0 %v395_v11  ;;  %6483 = vmatpush3.msra.mxu1 %v395_v11 }
  0x22   : > { %6473 = vmatprep.subr.mxu0 %v394_v13  ;;  %6484 = vmatprep.subr.mxu1 %v394_v13 }
  0x23   : > { %6474 = vmatpush3.msra.mxu0 %v394_v13  ;;  %6485 = vmatpush3.msra.mxu1 %v394_v13 }
  0x24   : > { %6475 = vmatprep.subr.mxu0 %v393_v14  ;;  %6486 = vmatprep.subr.mxu1 %v393_v14 }
  0x25   : > { %6476 = vmatpush3.msra.mxu0 %v393_v14  ;;  %6487 = vmatpush3.msra.mxu1 %v393_v14 }
  0x26   : > { %6477 = vmatprep.subr.mxu0 %v392_v15  ;;  %6488 = vmatprep.subr.mxu1 %v392_v15 }
  0x27   : > { %6478 = vmatpush3.msra.mxu0 %v392_v15  ;;  %6479 = vmatprep.mubr.msk.f32.mxu0 %vm404_vm0, %v372_v16 }
  0x28   : > { %6489 = vmatpush3.msra.mxu1 %v392_v15  ;;  %6490 = vmatprep.mubr.msk.f32.mxu1 %vm404_vm0, %v374_v17 }
  0x29   : > { %6480 = vmatmul.mubr.msk.f32.vlgmr.msra.gmra.mxu0 %vm404_vm0, %v373_v18  ;;  %6491 = vmatmul.mubr.msk.f32.vlgmr.msra.gmra.mxu1 %vm404_vm0, %v375_v19 }
  0x2a   : > { %6493 = vmatprep.subr.mxu0 %v395_v11  ;;  %6504 = vmatprep.subr.mxu1 %v395_v11 }
  0x2b   : > { %6494 = vmatpush3.msra.mxu0 %v395_v11  ;;  %6505 = vmatpush3.msra.mxu1 %v395_v11 }
  0x2c   : > { %6495 = vmatprep.subr.mxu0 %v394_v13  ;;  %6506 = vmatprep.subr.mxu1 %v394_v13 }
  0x2d   : > { %6496 = vmatpush3.msra.mxu0 %v394_v13  ;;  %6507 = vmatpush3.msra.mxu1 %v394_v13 }
  0x2e   : > { %6497 = vmatprep.subr.mxu0 %v393_v14  ;;  %6508 = vmatprep.subr.mxu1 %v393_v14 }
  0x2f   : > { %6498 = vmatpush3.msra.mxu0 %v393_v14  ;;  %6509 = vmatpush3.msra.mxu1 %v393_v14 }
  0x30   : > { %6499 = vmatprep.subr.mxu0 %v392_v15  ;;  %6510 = vmatprep.subr.mxu1 %v392_v15 }
  0x31   : > { %6500 = vmatpush3.msra.mxu0 %v392_v15  ;;  %6501 = vmatprep.mubr.msk.f32.mxu0 %vm404_vm0, %v376_v20 }
  0x32   : > { %6511 = vmatpush3.msra.mxu1 %v392_v15  ;;  %6512 = vmatprep.mubr.msk.f32.mxu1 %vm404_vm0, %v378_v21 }
  0x33   : > { %6502 = vmatmul.mubr.msk.f32.vlgmr.msra.gmra.mxu0 %vm404_vm0, %v377_v22  ;;  %6513 = vmatmul.mubr.msk.f32.vlgmr.msra.gmra.mxu1 %vm404_vm0, %v379_v23 }
  0x34   : > { %6515 = vmatprep.subr.mxu0 %v399_v24  ;;  %6526 = vmatprep.subr.mxu1 %v399_v24 }
  0x35   : > { %6516 = vmatpush3.msra.mxu0 %v399_v24  ;;  %6527 = vmatpush3.msra.mxu1 %v399_v24 }
  0x36   : > { %6517 = vmatprep.subr.mxu0 %v398_v25  ;;  %6528 = vmatprep.subr.mxu1 %v398_v25 }
  0x37   : > { %6518 = vmatpush3.msra.mxu0 %v398_v25  ;;  %6529 = vmatpush3.msra.mxu1 %v398_v25 }
  0x38   : > { %6519 = vmatprep.subr.mxu0 %v397_v26  ;;  %6530 = vmatprep.subr.mxu1 %v397_v26 }
  0x39   : > { %6520 = vmatpush3.msra.mxu0 %v397_v26  ;;  %6523 = vmatprep.mubr.msk.f32.mxu0 %vm404_vm0, %v380_v27 }
  0x3a   : > { %6521 = vmatprep.subr.mxu0 %v396_v28  ;;  %6531 = vmatpush3.msra.mxu1 %v397_v26 }
  0x3b   : > { %6522 = vmatpush3.msra.mxu0 %v396_v28  ;;  %6532 = vmatprep.subr.mxu1 %v396_v28 }
  0x3c   : > { %6537 = vmatprep.subr.mxu0 %v399_v24  ;;  %6524 = vmatmul.mubr.msk.f32.vlgmr.msra.gmra.mxu0 %vm404_vm0, %v381_v29 }
  0x3d   : > { %6538 = vmatpush3.msra.mxu0 %v399_v24  ;;  %6533 = vmatpush3.msra.mxu1 %v396_v28 }
  0x3e   : > { %6539 = vmatprep.subr.mxu0 %v398_v25  ;;  %6534 = vmatprep.mubr.msk.f32.mxu1 %vm404_vm0, %v382_v30 }
  0x3f   : > { %6540 = vmatpush3.msra.mxu0 %v398_v25  ;;  %6548 = vmatprep.subr.mxu1 %v399_v24 }
  0x40   : > { %6535 = vmatmul.mubr.msk.f32.vlgmr.msra.gmra.mxu1 %vm404_vm0, %v383_v31  ;;  %6541 = vmatprep.subr.mxu0 %v397_v26 }
  0x41   : > { %6549 = vmatpush3.msra.mxu1 %v399_v24  ;;  %6542 = vmatpush3.msra.mxu0 %v397_v26 }
  0x42   : > { %6550 = vmatprep.subr.mxu1 %v398_v25  ;;  %6543 = vmatprep.subr.mxu0 %v396_v28 }
  0x43   : > { %6551 = vmatpush3.msra.mxu1 %v398_v25  ;;  %6544 = vmatpush3.msra.mxu0 %v396_v28 }
  0x44   : > { %6552 = vmatprep.subr.mxu1 %v397_v26  ;;  %6545 = vmatprep.mubr.msk.f32.mxu0 %vm404_vm0, %v384_v32 }
  0x45   : > { %6553 = vmatpush3.msra.mxu1 %v397_v26  ;;  %6546 = vmatmul.mubr.msk.f32.vlgmr.msra.gmra.mxu0 %vm404_vm0, %v385_v33 }
  0x46   : > { %6554 = vmatprep.subr.mxu1 %v396_v28  ;;  %6556 = vmatprep.mubr.msk.f32.mxu1 %vm404_vm0, %v386_v34 }
  0x47   : > { %6555 = vmatpush3.msra.mxu1 %v396_v28 }
  0x48   : > { %6557 = vmatmul.mubr.msk.f32.vlgmr.msra.gmra.mxu1 %vm404_vm0, %v387_v35 }
  0xd4   : > { %v7170_v36 = vpop.f32.mrf.mxu0 }
  0xd6   : > { %v7172_v37 = vpop.f32.mrf.mxu0  ;;  %v7174_v38 = vpop.f32.mrf.mxu1 }
  0xd7   : > { %6563 = vmatprep.mubr.msk.f32.mxu0 %vm1377_vm1, %v7172_v37 }
  0xd8   : > { %v7178_v39 = vpop.f32.mrf.mxu1 }
  0xd9   : > { %6570 = vmatprep.mubr.msk.f32.mxu1 %vm1377_vm1, %v7178_v39 }
  0xde   : > { %v7184_v41 = vpop.f32.mrf.mxu0 }
  0xe0   : > { %v7182_v40 = vpop.f32.mrf.mxu1  ;;  %v7188_v43 = vpop.f32.mrf.mxu0 }
  0xe2   : > { %v7186_v42 = vpop.f32.mrf.mxu1 }
  0xe9   : > { %v7190_v44 = vpop.f32.mrf.mxu0  ;;  %v7192_v45 = vpop.f32.mrf.mxu1 }
  0xea   : > { %6559 = vmatprep.subr.msk.mxu0 %vm1377_vm1, %v7190_v44  ;;  %6566 = vmatprep.subr.msk.mxu1 %vm1377_vm1, %v7192_v45 }
  0xeb   : > { %v7198_v46 = vpop.f32.mrf.mxu0  ;;  %6560 = vmatpush3.xpose.msk.msra.mxu0 %vm1377_vm1, %v7190_v44  ;;  %6567 = vmatpush3.xpose.msk.msra.mxu1 %vm1377_vm1, %v7192_v45  ;;  %v7204_v47 = vpop.f32.mrf.mxu1 }
  0xec   : > { %6561 = vmatprep.subr.msk.mxu0 %vm1377_vm1, %v7198_v46  ;;  %6568 = vmatprep.subr.msk.mxu1 %vm1377_vm1, %v7204_v47 }
  0xef   : > { %6562 = vmatpush3.xpose.msk.msra.mxu0 %vm1377_vm1, %v7198_v46  ;;  %6569 = vmatpush3.xpose.msk.msra.mxu1 %vm1377_vm1, %v7204_v47 }
  0xf2   : > { %6564 = vmatmul.mubr.msk.f32.vlgmr.msra.gmra.mxu0 %vm1377_vm1, %v7170_v36  ;;  %6571 = vmatmul.mubr.msk.f32.vlgmr.msra.gmra.mxu1 %vm1377_vm1, %v7174_v38 }
  0xf3   : > { %v7218_v48 = vpop.f32.mrf.mxu0  ;;  %v7220_v49 = vpop.f32.mrf.mxu1  ;;  %6577 = vmatprep.mubr.msk.f32.mxu0 %vm1377_vm1, %v7188_v43  ;;  %6584 = vmatprep.mubr.msk.f32.mxu1 %vm1377_vm1, %v7186_v42 }
  0xf4   : > { %6573 = vmatprep.subr.msk.mxu0 %vm1377_vm1, %v7218_v48  ;;  %6580 = vmatprep.subr.msk.mxu1 %vm1377_vm1, %v7220_v49 }
  0xf5   : > { %v7230_v50 = vpop.f32.mrf.mxu0  ;;  %6574 = vmatpush3.xpose.msk.msra.mxu0 %vm1377_vm1, %v7218_v48  ;;  %6581 = vmatpush3.xpose.msk.msra.mxu1 %vm1377_vm1, %v7220_v49  ;;  %v7236_v51 = vpop.f32.mrf.mxu1 }
  0xf6   : > { %6575 = vmatprep.subr.msk.mxu0 %vm1377_vm1, %v7230_v50  ;;  %6582 = vmatprep.subr.msk.mxu1 %vm1377_vm1, %v7236_v51 }
  0xf9   : > { %6576 = vmatpush3.xpose.msk.msra.mxu0 %vm1377_vm1, %v7230_v50  ;;  %6583 = vmatpush3.xpose.msk.msra.mxu1 %vm1377_vm1, %v7236_v51 }
  0xfc   : > { %6578 = vmatmul.mubr.msk.f32.vlgmr.msra.gmra.mxu0 %vm1377_vm1, %v7184_v41  ;;  %6585 = vmatmul.mubr.msk.f32.vlgmr.msra.gmra.mxu1 %vm1377_vm1, %v7182_v40  ;;  %v7250_v52 = vpop.f32.mrf.mxu0 }
  0xfd   : > { %6587 = vmatprep.subr.msk.mxu0 %vm1822_vm2, %v7250_v52 }
  0xfe   : > { %v7254_v53 = vpop.f32.mrf.mxu0  ;;  %6588 = vmatpush3.msk.msra.mxu0 %vm1822_vm2, %v7250_v52 }
  0xff   : > { %6589 = vmatprep.subr.mxu0 %v7254_v53 }
 0x100   : > { %v7259_v54 = vpop.f32.mrf.mxu1  ;;  %6590 = vmatpush3.msra.mxu0 %v7254_v53 }
 0x101   : > { %6594 = vmatprep.subr.msk.mxu1 %vm1822_vm2, %v7259_v54 }
 0x102   : > { %v7264_v55 = vpop.f32.mrf.mxu1  ;;  %6595 = vmatpush3.msk.msra.mxu1 %vm1822_vm2, %v7259_v54 }
 0x103   : > { %6596 = vmatprep.subr.mxu1 %v7264_v55 }
 0x104   : > { %6597 = vmatpush3.msra.mxu1 %v7264_v55 }
 0x105   : > { %v7270_v56 = vpop.f32.mrf.mxu0 }
 0x106   : > { %6601 = vmatprep.subr.msk.mxu0 %vm1822_vm2, %v7270_v56 }
 0x107   : > { %v7280_v59 = vpop.f32.mrf.mxu0 }
 0x108   : > { %v7274_v57 = vpop.f32.mrf.mxu1 }
 0x109   : > { %6608 = vmatprep.subr.msk.mxu1 %vm1822_vm2, %v7274_v57 }
 0x10a   : > { %v7278_v58 = vpop.f32.mrf.mxu1 }
 0x1b2   : > { %v6565_v60 = vpop.f32.mrf.mxu0  ;;  %v6572_v61 = vpop.f32.mrf.mxu1 }
 0x1b3   : > { %v1737_v62 = vsel %vm1730_vm3, %v6572_v61, -inf  ;;  %v1731_v63 = vsel %vm1730_vm3, %v6565_v60, -inf }
 0x1b4   : > { %1738 = vmax.xlane.f32.xlu1 %v1737_v62  ;;  %v1543_v0 = vpop.f32.mrf.mxu1  ;;  %1732 = vmax.xlane.f32.xlu0 %v1731_v63  ;;  %v1456_v1 = vpop.f32.mrf.mxu0 }
 0x1b5   : > { %v1734_v2 = vsel %vm1726_vm4, %v1543_v0, -inf  ;;  %v1727_v3 = vsel %vm1726_vm4, %v1456_v1, -inf }
 0x1b8   : > { %1735 = vmax.xlane.f32.xlu1 %v1734_v2  ;;  %1728 = vmax.xlane.f32.xlu0 %v1727_v3 }
 0x1bc   : > { %v6579_v4 = vpop.f32.mrf.mxu0  ;;  %v6586_v5 = vpop.f32.mrf.mxu1 }
 0x1bd   : > { %v1743_v6 = vsel %vm1730_vm3, %v6579_v4, -inf  ;;  %v1749_v10 = vsel %vm1730_vm3, %v6586_v5, -inf }
 0x1be   : > { %1744 = vmax.xlane.f32.xlu1 %v1743_v6  ;;  %v1630_v7 = vpop.f32.mrf.mxu0  ;;  %v1717_v9 = vpop.f32.mrf.mxu1 }
 0x1bf   : > { %v1740_v8 = vsel %vm1726_vm4, %v1630_v7, -inf  ;;  %v1746_v11 = vsel %vm1726_vm4, %v1717_v9, -inf }
 0x1c0   : > { %1741 = vmax.xlane.f32.xlu0 %v1740_v8 }
 0x1c2   : > { %1750 = vmax.xlane.f32.xlu1 %v1749_v10 }
 0x1c4   : > { %1747 = vmax.xlane.f32.xlu0 %v1746_v11 }
 0x1d3   : > { %2250 = vrot.lane.b32.xlu1 %v7192_v45, %s7010_s22 }
 0x1d7   : > { %2157 = vrot.lane.b32.xlu1 %v7198_v46, %s7010_s22 }
 0x1da   : > { %2159 = vrot.lane.b32.xlu0 %v7190_v44, %s7010_s22 }
 0x1db   : > { %2248 = vrot.lane.b32.xlu1 %v7204_v47, %s7010_s22 }
 0x1de   : > { %2153 = vrot.lane.b32.xlu0 %v7172_v37, %s7010_s22 }
 0x1df   : > { %2341 = vrot.lane.b32.xlu1 %v7218_v48, %s7010_s22 }
 0x1e2   : > { %2155 = vrot.lane.b32.xlu0 %v7170_v36, %s7010_s22 }
 0x1e3   : > { %2244 = vrot.lane.b32.xlu1 %v7178_v39, %s7010_s22 }
 0x23d   : > { %v1739_v12 = vpop.xlane.xlu1 %1738  ;;  %v1733_v13 = vpop.xlane.xlu0 %1732 }
 0x23e   : > { %v1755_v14 = vsub.f32 %v6572_v61, %v1739_v12  ;;  %v1753_v15 = vsub.f32 %v6565_v60, %v1733_v13 }
 0x240   : > { %v1762_v16 = vmul.f32 1.442695, %v1753_v15  ;;  %v1766_v17 = vmul.f32 1.442695, %v1755_v14 }
 0x241   : > { %v1736_v18 = vpop.xlane.xlu1 %1735  ;;  %v1729_v19 = vpop.xlane.xlu0 %1728 }
 0x242   : > { %v1754_v20 = vsub.f32 %v1543_v0, %v1736_v18  ;;  %v1752_v21 = vsub.f32 %v1456_v1, %v1729_v19  ;;  %6874 = vpow2.f32 %v1762_v16 }
 0x243   : > { %6876 = vpow2.f32 %v1766_v17 }
 0x244   : > { %v1760_v22 = vmul.f32 1.442695, %v1752_v21  ;;  %v1764_v23 = vmul.f32 1.442695, %v1754_v20 }
 0x246   : > { %6878 = vpow2.f32 %v1760_v22 }
 0x247   : > { %v1745_v24 = vpop.xlane.xlu1 %1744  ;;  %6880 = vpow2.f32 %v1764_v23 }
 0x248   : > { %v1757_v25 = vsub.f32 %v6579_v4, %v1745_v24 }
 0x249   : > { %v1742_v26 = vpop.xlane.xlu0 %1741 }
 0x24a   : > { %v1770_v27 = vmul.f32 1.442695, %v1757_v25  ;;  %v1756_v28 = vsub.f32 %v1630_v7, %v1742_v26 }
 0x24b   : > { %v1751_v29 = vpop.xlane.xlu1 %1750 }
 0x24c   : > { %6882 = vpow2.f32 %v1770_v27  ;;  %v1768_v30 = vmul.f32 1.442695, %v1756_v28  ;;  %v1759_v31 = vsub.f32 %v6586_v5, %v1751_v29 }
 0x24d   : > { %v1748_v32 = vpop.xlane.xlu0 %1747 }
 0x24e   : > { %6884 = vpow2.f32 %v1768_v30  ;;  %v1774_v33 = vmul.f32 1.442695, %v1759_v31  ;;  %v1758_v34 = vsub.f32 %v1717_v9, %v1748_v32 }
 0x24f   : > { %v7306_v35 = vpop.eup %6874  ;;  %v7345_v12 = vpop.permute.xlu1 %2250 }
 0x250   : > { %6886 = vpow2.f32 %v1774_v33  ;;  %v1772_v60 = vmul.f32 1.442695, %v1758_v34  ;;  %v1779_v61 = vsel %vm1730_vm3, %v7306_v35, 0.0  ;;  %v7310_v62 = vpop.eup %6876 }
 0x251   : > { %1780 = vadd.xlane.f32.xlu1 %v1779_v61  ;;  %v1785_v0 = vsel %vm1730_vm3, %v7310_v62, 0.0  ;;  %v2160_v15 = vpop.permute.xlu0 %2159 }
 0x252   : > { %6888 = vpow2.f32 %v1772_v60 }
 0x253   : > { %v6879_v63 = vpop.eup %6878  ;;  %v2158_v13 = vpop.permute.xlu1 %2157 }
 0x254   : > { %v1776_v1 = vsel %vm1726_vm4, %v6879_v63, 0.0  ;;  %v6881_v2 = vpop.eup %6880 }
 0x255   : > { %1786 = vadd.xlane.f32.xlu1 %v1785_v0  ;;  %1777 = vadd.xlane.f32.xlu0 %v1776_v1  ;;  %v1782_v4 = vsel %vm1726_vm4, %v6881_v2, 0.0  ;;  %v2154_v17 = vpop.permute.xlu0 %2153 }
 0x257   : > { %v7347_v14 = vpop.permute.xlu1 %2248 }
 0x259   : > { %v7315_v3 = vpop.eup %6882  ;;  %1783 = vadd.xlane.f32.xlu0 %v1782_v4  ;;  %v2156_v19 = vpop.permute.xlu0 %2155 }
 0x25a   : > { %v1791_v5 = vsel %vm1730_vm3, %v7315_v3, 0.0 }
 0x25b   : > { %v6885_v6 = vpop.eup %6884  ;;  %1792 = vadd.xlane.f32.xlu1 %v1791_v5  ;;  %v7349_v16 = vpop.permute.xlu1 %2341 }
 0x25c   : > { %v1788_v8 = vsel %vm1726_vm4, %v6885_v6, 0.0 }
 0x25d   : > { %v7320_v7 = vpop.eup %6886  ;;  %1789 = vadd.xlane.f32.xlu0 %v1788_v8 }
 0x25e   : > { %v1797_v9 = vsel %vm1730_vm3, %v7320_v7, 0.0 }
 0x25f   : > { %v7325_v10 = vpop.eup %6888  ;;  %1798 = vadd.xlane.f32.xlu1 %v1797_v9  ;;  %v2245_v18 = vpop.permute.xlu1 %2244 }
 0x260   : > { %v1794_v11 = vsel %vm1726_vm4, %v7325_v10, 0.0 }
 0x261   : > { %1795 = vadd.xlane.f32.xlu0 %v1794_v11 }
 0x270   : > { %2246 = vrot.lane.b32.xlu1 %v7174_v38, %s7010_s22 }
 0x274   : > { %2430 = vrot.lane.b32.xlu1 %v7236_v51, %s7010_s22 }
 0x277   : > { %2432 = vrot.lane.b32.xlu0 %v7220_v49, %s7010_s22 }
 0x278   : > { %2337 = vrot.lane.b32.xlu1 %v7184_v41, %s7010_s22 }
 0x27b   : > { %2339 = vrot.lane.b32.xlu0 %v7230_v50, %s7010_s22 }
 0x27c   : > { %2428 = vrot.lane.b32.xlu1 %v7182_v40, %s7010_s22 }
 0x27f   : > { %2335 = vrot.lane.b32.xlu0 %v7188_v43, %s7010_s22 }
 0x283   : > { %2426 = vrot.lane.b32.xlu0 %v7186_v42, %s7010_s22 }
 0x2da   : > { %v1781_v20 = vpop.xlane.xlu1 %1780 }
 0x2db   : > { %6890 = vrcp.f32 %v1781_v20 }
 0x2de   : > { %v1787_v21 = vpop.xlane.xlu1 %1786  ;;  %v1778_v22 = vpop.xlane.xlu0 %1777 }
 0x2df   : > { %6892 = vrcp.f32 %v1778_v22 }
 0x2e0   : > { %6894 = vrcp.f32 %v1787_v21 }
 0x2e2   : > { %v1784_v23 = vpop.xlane.xlu0 %1783 }
 0x2e3   : > { %6896 = vrcp.f32 %v1784_v23 }
 0x2e4   : > { %v1793_v24 = vpop.xlane.xlu1 %1792 }
 0x2e5   : > { %6898 = vrcp.f32 %v1793_v24 }
 0x2e6   : > { %v1790_v25 = vpop.xlane.xlu0 %1789 }
 0x2e7   : > { %6900 = vrcp.f32 %v1790_v25 }
 0x2e8   : > { %v1799_v26 = vpop.xlane.xlu1 %1798  ;;  %v6891_v28 = vpop.eup %6890 }
 0x2e9   : > { %6902 = vrcp.f32 %v1799_v26  ;;  %v1809_v32 = vmul.f32 %v6891_v28, %v7306_v35 }
 0x2ea   : > { %v1796_v27 = vpop.xlane.xlu0 %1795 }
 0x2eb   : > { %6904 = vrcp.f32 %v1796_v27 }
 0x2ec   : > { %v6893_v29 = vpop.eup %6892  ;;  %v2247_v4 = vpop.permute.xlu1 %2246 }
 0x2ed   : > { %v1808_v30 = vmul.f32 %v6893_v29, %v6879_v63  ;;  %v6895_v31 = vpop.eup %6894 }
 0x2ee   : > { %v1811_v60 = vmul.f32 %v6895_v31, %v7310_v62  ;;  %v2433_v0 = vpop.permute.xlu0 %2432 }
 0x2ef   : > { %6591 = vmatprep.mubr.msk.f32.mxu0 %vm1726_vm4, %v1808_v30 }
 0x2f0   : > { %v6897_v33 = vpop.eup %6896  ;;  %6592 = vmatmul.mubr.msk.f32.vlgmr.msra.gmra.mxu0 %vm1726_vm4, %v1809_v32  ;;  %v2431_v8 = vpop.permute.xlu1 %2430 }
 0x2f1   : > { %v1810_v34 = vmul.f32 %v6897_v33, %v6881_v2  ;;  %6602 = vmatpush3.msk.msra.mxu0 %vm1822_vm2, %v7270_v56 }
 0x2f2   : > { %v6899_v61 = vpop.eup %6898  ;;  %6603 = vmatprep.subr.mxu0 %v7280_v59  ;;  %v2340_v5 = vpop.permute.xlu0 %2339 }
 0x2f3   : > { %6598 = vmatprep.mubr.msk.f32.mxu1 %vm1726_vm4, %v1810_v34  ;;  %6604 = vmatpush3.msra.mxu0 %v7280_v59  ;;  %v1813_v62 = vmul.f32 %v6899_v61, %v7315_v3 }
 0x2f4   : > { %v6901_v63 = vpop.eup %6900  ;;  %6599 = vmatmul.mubr.msk.f32.vlgmr.msra.gmra.mxu1 %vm1726_vm4, %v1811_v60  ;;  %6615 = vmatprep.subr.msk.mxu0 %vm1377_vm1, %v2160_v15 }
 0x2f5   : > { %6609 = vmatpush3.msk.msra.mxu1 %vm1822_vm2, %v7274_v57  ;;  %v1812_v35 = vmul.f32 %v6901_v63, %v6885_v6 }
 0x2f6   : > { %6610 = vmatprep.subr.mxu1 %v7278_v58  ;;  %v6903_v1 = vpop.eup %6902  ;;  %v2336_v9 = vpop.permute.xlu0 %2335 }
 0x2f7   : > { %6611 = vmatpush3.msra.mxu1 %v7278_v58  ;;  %6605 = vmatprep.mubr.msk.f32.mxu0 %vm1726_vm4, %v1812_v35  ;;  %v1815_v3 = vmul.f32 %v6903_v1, %v7320_v7  ;;  %v2338_v7 = vpop.permute.xlu1 %2337 }
 0x2f8   : > { %v6905_v2 = vpop.eup %6904  ;;  %6622 = vmatprep.subr.msk.mxu1 %vm1377_vm1, %v7345_v12  ;;  %6606 = vmatmul.mubr.msk.f32.vlgmr.msra.gmra.mxu0 %vm1726_vm4, %v1813_v62 }
 0x2f9   : > { %6616 = vmatpush3.xpose.msk.msra.mxu0 %vm1377_vm1, %v2160_v15  ;;  %6619 = vmatprep.mubr.msk.f32.mxu0 %vm1377_vm1, %v2154_v17  ;;  %v1814_v6 = vmul.f32 %v6905_v2, %v7325_v10 }
 0x2fa   : > { %6617 = vmatprep.subr.msk.mxu0 %vm1377_vm1, %v2158_v13  ;;  %v2427_v10 = vpop.permute.xlu0 %2426 }
 0x2fb   : > { %6612 = vmatprep.mubr.msk.f32.mxu1 %vm1726_vm4, %v1814_v6  ;;  %v2429_v11 = vpop.permute.xlu1 %2428 }
 0x2fc   : > { %6613 = vmatmul.mubr.msk.f32.vlgmr.msra.gmra.mxu1 %vm1726_vm4, %v1815_v3 }
 0x2fd   : > { %6618 = vmatpush3.xpose.msk.msra.mxu0 %vm1377_vm1, %v2158_v13  ;;  %6623 = vmatpush3.xpose.msk.msra.mxu1 %vm1377_vm1, %v7345_v12 }
 0x2fe   : > { %6624 = vmatprep.subr.msk.mxu1 %vm1377_vm1, %v7347_v14  ;;  %6626 = vmatprep.mubr.msk.f32.mxu1 %vm1377_vm1, %v2245_v18 }
 0x2ff   : > { %6629 = vmatprep.subr.msk.mxu0 %vm1377_vm1, %v7349_v16 }
 0x300   : > { %6620 = vmatmul.mubr.msk.f32.vlgmr.msra.gmra.mxu0 %vm1377_vm1, %v2156_v19 }
 0x301   : > { %6625 = vmatpush3.xpose.msk.msra.mxu1 %vm1377_vm1, %v7347_v14  ;;  %6630 = vmatpush3.xpose.msk.msra.mxu0 %vm1377_vm1, %v7349_v16 }
 0x302   : > { %6633 = vmatprep.mubr.msk.f32.mxu0 %vm1377_vm1, %v2336_v9  ;;  %6631 = vmatprep.subr.msk.mxu0 %vm1377_vm1, %v2340_v5 }
 0x303   : > { %6636 = vmatprep.subr.msk.mxu1 %vm1377_vm1, %v2433_v0 }
 0x304   : > { %6627 = vmatmul.mubr.msk.f32.vlgmr.msra.gmra.mxu1 %vm1377_vm1, %v2247_v4 }
 0x305   : > { %6632 = vmatpush3.xpose.msk.msra.mxu0 %vm1377_vm1, %v2340_v5  ;;  %6637 = vmatpush3.xpose.msk.msra.mxu1 %vm1377_vm1, %v2433_v0 }
 0x306   : > { %6640 = vmatprep.mubr.msk.f32.mxu1 %vm1377_vm1, %v2427_v10  ;;  %6638 = vmatprep.subr.msk.mxu1 %vm1377_vm1, %v2431_v8 }
 0x308   : > { %6634 = vmatmul.mubr.msk.f32.vlgmr.msra.gmra.mxu0 %vm1377_vm1, %v2338_v7 }
 0x309   : > { %6639 = vmatpush3.xpose.msk.msra.mxu1 %vm1377_vm1, %v2431_v8 }
 0x30c   : > { %6641 = vmatmul.mubr.msk.f32.vlgmr.msra.gmra.mxu1 %vm1377_vm1, %v2429_v11 }
 0x3b0   : > { %v7402_v12 = vpop.f32.mrf.mxu0 }
 0x3b2   : > { %v7404_v13 = vpop.f32.mrf.mxu0 }
 0x3b4   : > { %v7406_v14 = vpop.f32.mrf.mxu1 }
 0x3b6   : > { %v7410_v16 = vpop.f32.mrf.mxu1 }
 0x3b8   : > { %v7408_v15 = vpop.f32.mrf.mxu0 }
 0x3ba   : > { %v7412_v17 = vpop.f32.mrf.mxu0 }
 0x3bc   : > { %v7414_v18 = vpop.f32.mrf.mxu1 }
 0x3be   : > { %v7417_v21 = vpop.f32.mrf.mxu1 }
 0x3c0   : > { %v6621_v19 = vpop.f32.mrf.mxu0 }
 0x3c1   : > { %v2520_v20 = vsel %vm1730_vm3, %v6621_v19, -inf }
 0x3c2   : > { %2521 = vmax.xlane.f32.xlu1 %v2520_v20  ;;  %v2235_v24 = vpop.f32.mrf.mxu0 }
 0x3c3   : > { %v2517_v26 = vsel %vm1726_vm4, %v2235_v24, -inf }
 0x3c4   : > { %v6628_v22 = vpop.f32.mrf.mxu1 }
 0x3c5   : > { %v2526_v23 = vsel %vm1730_vm3, %v6628_v22, -inf }
 0x3c6   : > { %2527 = vmax.xlane.f32.xlu0 %v2526_v23  ;;  %v2326_v28 = vpop.f32.mrf.mxu1 }
 0x3c7   : > { %v2523_v30 = vsel %vm1726_vm4, %v2326_v28, -inf }
 0x3c8   : > { %v6635_v25 = vpop.f32.mrf.mxu0 }
 0x3c9   : > { %v2532_v27 = vsel %vm1730_vm3, %v6635_v25, -inf }
 0x3ca   : > { %2518 = vmax.xlane.f32.xlu0 %v2517_v26  ;;  %2533 = vmax.xlane.f32.xlu1 %v2532_v27  ;;  %v2417_v32 = vpop.f32.mrf.mxu0 }
 0x3cb   : > { %v2529_v33 = vsel %vm1726_vm4, %v2417_v32, -inf }
 0x3cc   : > { %v6642_v29 = vpop.f32.mrf.mxu1 }
 0x3cd   : > { %v2538_v31 = vsel %vm1730_vm3, %v6642_v29, -inf }
 0x3ce   : > { %2524 = vmax.xlane.f32.xlu0 %v2523_v30  ;;  %2539 = vmax.xlane.f32.xlu1 %v2538_v31  ;;  %v2508_v34 = vpop.f32.mrf.mxu1 }
 0x3cf   : > { %v2535_v60 = vsel %vm1726_vm4, %v2508_v34, -inf }
 0x3d2   : > { %2530 = vmax.xlane.f32.xlu0 %v2529_v33 }
 0x3d6   : > { %2536 = vmax.xlane.f32.xlu0 %v2535_v60 }
 0x3df   : > { %2697 = vrot.lane.b32.xlu1 %v7259_v54, %s7010_s22 }
 0x3e3   : > { %2606 = vrot.lane.b32.xlu1 %v7254_v53, %s7010_s22 }
 0x3e7   : > { %2695 = vrot.lane.b32.xlu1 %v7264_v55, %s7010_s22 }
 0x3eb   : > { %2875 = vrot.lane.b32.xlu1 %v7274_v57, %s7010_s22 }
 0x3ec   : > { %2608 = vrot.lane.b32.xlu0 %v7250_v52, %s7010_s22 }
 0x3f0   : > { %2786 = vrot.lane.b32.xlu0 %v7270_v56, %s7010_s22 }
 0x44b   : > { %v2522_v61 = vpop.xlane.xlu1 %2521 }
 0x44c   : > { %v2542_v0 = vsub.f32 %v6621_v19, %v2522_v61 }
 0x44e   : > { %v2551_v63 = vmul.f32 1.442695, %v2542_v0 }
 0x44f   : > { %v2528_v35 = vpop.xlane.xlu0 %2527 }
 0x450   : > { %6906 = vpow2.f32 %v2551_v63  ;;  %v2544_v62 = vsub.f32 %v6628_v22, %v2528_v35 }
 0x452   : > { %v2555_v1 = vmul.f32 1.442695, %v2544_v62 }
 0x453   : > { %v2534_v2 = vpop.xlane.xlu1 %2533  ;;  %v2519_v4 = vpop.xlane.xlu0 %2518 }
 0x454   : > { %6908 = vpow2.f32 %v2555_v1  ;;  %v2546_v5 = vsub.f32 %v6635_v25, %v2534_v2  ;;  %v2541_v6 = vsub.f32 %v2235_v24, %v2519_v4 }
 0x456   : > { %v2559_v3 = vmul.f32 1.442695, %v2546_v5  ;;  %v2549_v8 = vmul.f32 1.442695, %v2541_v6 }
 0x457   : > { %v2540_v9 = vpop.xlane.xlu1 %2539  ;;  %v2525_v7 = vpop.xlane.xlu0 %2524 }
 0x458   : > { %6910 = vpow2.f32 %v2559_v3  ;;  %v2548_v10 = vsub.f32 %v6642_v29, %v2540_v9  ;;  %v2543_v11 = vsub.f32 %v2326_v28, %v2525_v7 }
 0x459   : > { %6912 = vpow2.f32 %v2549_v8 }
 0x45a   : > { %v2563_v20 = vmul.f32 1.442695, %v2548_v10  ;;  %v2553_v19 = vmul.f32 1.442695, %v2543_v11 }
 0x45b   : > { %v2698_v23 = vpop.permute.xlu1 %2697  ;;  %v2531_v26 = vpop.xlane.xlu0 %2530 }
 0x45c   : > { %6914 = vpow2.f32 %v2563_v20  ;;  %v2545_v22 = vsub.f32 %v2417_v32, %v2531_v26  ;;  %6650 = vmatprep.subr.msk.mxu1 %vm1822_vm2, %v2698_v23 }
 0x45d   : > { %v7439_v27 = vpop.eup %6906  ;;  %6916 = vpow2.f32 %v2553_v19  ;;  %6651 = vmatpush3.msk.msra.mxu1 %vm1822_vm2, %v2698_v23 }
 0x45e   : > { %v2557_v24 = vmul.f32 1.442695, %v2545_v22  ;;  %v2568_v25 = vsel %vm1730_vm3, %v7439_v27, 0.0 }
 0x45f   : > { %2569 = vadd.xlane.f32.xlu1 %v2568_v25  ;;  %v2607_v28 = vpop.permute.xlu1 %2606  ;;  %v2537_v29 = vpop.xlane.xlu0 %2536 }
 0x460   : > { %6918 = vpow2.f32 %v2557_v24  ;;  %v2547_v30 = vsub.f32 %v2508_v34, %v2537_v29 }
 0x461   : > { %v7444_v31 = vpop.eup %6908 }
 0x462   : > { %v2561_v33 = vmul.f32 1.442695, %v2547_v30  ;;  %v2574_v32 = vsel %vm1730_vm3, %v7444_v31, 0.0 }
 0x463   : > { %v2696_v60 = vpop.permute.xlu1 %2695  ;;  %2575 = vadd.xlane.f32.xlu1 %v2574_v32  ;;  %v2609_v61 = vpop.permute.xlu0 %2608 }
 0x464   : > { %6920 = vpow2.f32 %v2561_v33  ;;  %6643 = vmatprep.subr.msk.mxu0 %vm1822_vm2, %v2609_v61  ;;  %6652 = vmatprep.subr.mxu1 %v2696_v60 }
 0x465   : > { %v7449_v0 = vpop.eup %6910  ;;  %6644 = vmatpush3.msk.msra.mxu0 %vm1822_vm2, %v2609_v61  ;;  %6653 = vmatpush3.msra.mxu1 %v2696_v60 }
 0x466   : > { %v6913_v63 = vpop.eup %6912  ;;  %6645 = vmatprep.subr.mxu0 %v2607_v28  ;;  %v2580_v34 = vsel %vm1730_vm3, %v7449_v0, 0.0 }
 0x467   : > { %v7454_v35 = vpop.permute.xlu1 %2875  ;;  %2581 = vadd.xlane.f32.xlu1 %v2580_v34  ;;  %v2565_v62 = vsel %vm1726_vm4, %v6913_v63, 0.0  ;;  %6646 = vmatpush3.msra.mxu0 %v2607_v28  ;;  %v2787_v1 = vpop.permute.xlu0 %2786 }
 0x468   : > { %2566 = vadd.xlane.f32.xlu0 %v2565_v62  ;;  %6657 = vmatprep.subr.msk.mxu0 %vm1822_vm2, %v2787_v1 }
 0x469   : > { %v7458_v2 = vpop.eup %6914  ;;  %6664 = vmatprep.subr.msk.mxu1 %vm1822_vm2, %v7454_v35 }
 0x46a   : > { %v6917_v4 = vpop.eup %6916  ;;  %v2586_v5 = vsel %vm1730_vm3, %v7458_v2, 0.0 }
 0x46b   : > { %2587 = vadd.xlane.f32.xlu1 %v2586_v5  ;;  %v2571_v6 = vsel %vm1726_vm4, %v6917_v4, 0.0 }
 0x46c   : > { %2572 = vadd.xlane.f32.xlu0 %v2571_v6 }
 0x46d   : > { %v6919_v3 = vpop.eup %6918 }
 0x46e   : > { %v2577_v8 = vsel %vm1726_vm4, %v6919_v3, 0.0 }
 0x470   : > { %2578 = vadd.xlane.f32.xlu0 %v2577_v8 }
 0x471   : > { %v7466_v9 = vpop.eup %6920 }
 0x472   : > { %v2583_v7 = vsel %vm1726_vm4, %v7466_v9, 0.0 }
 0x474   : > { %2584 = vadd.xlane.f32.xlu0 %v2583_v7 }
 0x47c   : > { %2873 = vrot.lane.b32.xlu1 %v7278_v58, %s7010_s22 }
 0x480   : > { %3706 = vrot.lane.b32.xlu1 %v7192_v45, %s7011_s23 }
 0x484   : > { %3704 = vrot.lane.b32.xlu1 %v7204_v47, %s7011_s23 }
 0x488   : > { %3797 = vrot.lane.b32.xlu1 %v7218_v48, %s7011_s23 }
 0x48a   : > { %2784 = vrot.lane.b32.xlu0 %v7280_v59, %s7010_s22 }
 0x48c   : > { %3700 = vrot.lane.b32.xlu1 %v7178_v39, %s7011_s23 }
 0x48e   : > { %3615 = vrot.lane.b32.xlu0 %v7190_v44, %s7011_s23 }
 0x490   : > { %3702 = vrot.lane.b32.xlu1 %v7174_v38, %s7011_s23 }
 0x492   : > { %3613 = vrot.lane.b32.xlu0 %v7198_v46, %s7011_s23 }
 0x494   : > { %3886 = vrot.lane.b32.xlu1 %v7236_v51, %s7011_s23 }
 0x496   : > { %3609 = vrot.lane.b32.xlu0 %v7172_v37, %s7011_s23 }
 0x498   : > { %3793 = vrot.lane.b32.xlu1 %v7184_v41, %s7011_s23 }
 0x49a   : > { %3611 = vrot.lane.b32.xlu0 %v7170_v36, %s7011_s23 }
 0x49c   : > { %3884 = vrot.lane.b32.xlu1 %v7182_v40, %s7011_s23 }
 0x49e   : > { %3888 = vrot.lane.b32.xlu0 %v7220_v49, %s7011_s23 }
 0x4a2   : > { %3795 = vrot.lane.b32.xlu0 %v7230_v50, %s7011_s23 }
 0x4a6   : > { %3791 = vrot.lane.b32.xlu0 %v7188_v43, %s7011_s23 }
 0x4aa   : > { %3882 = vrot.lane.b32.xlu0 %v7186_v42, %s7011_s23 }
 0x4e8   : > { %v2570_v10 = vpop.xlane.xlu1 %2569 }
 0x4e9   : > { %6922 = vrcp.f32 %v2570_v10 }
 0x4ec   : > { %v2576_v11 = vpop.xlane.xlu1 %2575 }
 0x4f0   : > { %v2582_v19 = vpop.xlane.xlu1 %2581 }
 0x4f1   : > { %v2567_v20 = vpop.xlane.xlu0 %2566 }
 0x4f2   : > { %6924 = vrcp.f32 %v2567_v20  ;;  %v400_v20 = vld [vmem:[%s7868_s6] sm:$0xff] }
 0x4f3   : > { %6926 = vrcp.f32 %v2576_v11 }
 0x4f4   : > { %v2588_v22 = vpop.xlane.xlu1 %2587 }
 0x4f5   : > { %v2573_v23 = vpop.xlane.xlu0 %2572 }
 0x4f6   : > { %6928 = vrcp.f32 %v2573_v23  ;;  %v6923_v25 = vpop.eup %6922 }
 0x4f7   : > { %6930 = vrcp.f32 %v2582_v19  ;;  %v2598_v30 = vmul.f32 %v6923_v25, %v7439_v27 }
 0x4f8   : > { %v2874_v27 = vpop.permute.xlu1 %2873 }
 0x4f9   : > { %v2579_v26 = vpop.xlane.xlu0 %2578 }
 0x4fa   : > { %6932 = vrcp.f32 %v2579_v26 }
 0x4fb   : > { %6934 = vrcp.f32 %v2588_v22 }
 0x4fd   : > { %v2585_v24 = vpop.xlane.xlu0 %2584 }
 0x4fe   : > { %6936 = vrcp.f32 %v2585_v24 }
 0x4ff   : > { %v6925_v28 = vpop.eup %6924 }
 0x500   : > { %v2597_v29 = vmul.f32 %v6925_v28, %v6913_v63  ;;  %v6927_v33 = vpop.eup %6926 }
 0x501   : > { %v2785_v60 = vpop.permute.xlu0 %2784  ;;  %v2600_v34 = vmul.f32 %v6927_v33, %v7444_v31 }
 0x502   : > { %6647 = vmatprep.mubr.msk.f32.mxu0 %vm1726_vm4, %v2597_v29 }
 0x503   : > { %v6929_v32 = vpop.eup %6928  ;;  %6648 = vmatmul.mubr.msk.f32.vlgmr.msra.gmra.mxu0 %vm1726_vm4, %v2598_v30 }
 0x504   : > { %6658 = vmatpush3.msk.msra.mxu0 %vm1822_vm2, %v2787_v1  ;;  %v2599_v61 = vmul.f32 %v6929_v32, %v6917_v4  ;;  %v6931_v62 = vpop.eup %6930 }
 0x505   : > { %6659 = vmatprep.subr.mxu0 %v2785_v60  ;;  %v2602_v6 = vmul.f32 %v6931_v62, %v7449_v0  ;;  %v3616_v0 = vpop.permute.xlu0 %3615 }
 0x506   : > { %6660 = vmatpush3.msra.mxu0 %v2785_v60  ;;  %6654 = vmatprep.mubr.msk.f32.mxu1 %vm1726_vm4, %v2599_v61 }
 0x507   : > { %v6933_v63 = vpop.eup %6932  ;;  %6655 = vmatmul.mubr.msk.f32.vlgmr.msra.gmra.mxu1 %vm1726_vm4, %v2600_v34 }
 0x508   : > { %6665 = vmatpush3.msk.msra.mxu1 %vm1822_vm2, %v7454_v35  ;;  %v2601_v5 = vmul.f32 %v6933_v63, %v6919_v3  ;;  %v6935_v1 = vpop.eup %6934  ;;  %v401_v35 = vld [vmem:[%s7868_s6 + $0x8] sm:$0xff]  ;;  %v3707_v3 = vpop.permute.xlu1 %3706 }
 0x509   : > { %6666 = vmatprep.subr.mxu1 %v2874_v27  ;;  %v2604_v8 = vmul.f32 %v6935_v1, %v7458_v2  ;;  %6671 = vmatprep.subr.mxu0 %v401_v35  ;;  %v3614_v7 = vpop.permute.xlu0 %3613 }
 0x50a   : > { %6667 = vmatpush3.msra.mxu1 %v2874_v27  ;;  %6661 = vmatprep.mubr.msk.f32.mxu0 %vm1726_vm4, %v2601_v5 }
 0x50b   : > { %v6937_v31 = vpop.eup %6936  ;;  %6662 = vmatmul.mubr.msk.f32.vlgmr.msra.gmra.mxu0 %vm1726_vm4, %v2602_v6  ;;  %6676 = vmatprep.subr.mxu1 %v401_v35 }
 0x50c   : > { %v2603_v4 = vmul.f32 %v6937_v31, %v7466_v9  ;;  %6672 = vmatpush3.msra.mxu0 %v401_v35  ;;  %v3705_v2 = vpop.permute.xlu1 %3704 }
 0x50d   : > { %6681 = vmatprep.subr.mxu0 %v401_v35  ;;  %v3610_v11 = vpop.permute.xlu0 %3609 }
 0x50e   : > { %6668 = vmatprep.mubr.msk.f32.mxu1 %vm1726_vm4, %v2603_v4 }
 0x50f   : > { %6669 = vmatmul.mubr.msk.f32.vlgmr.msra.gmra.mxu1 %vm1726_vm4, %v2604_v8 }
 0x510   : > { %6677 = vmatpush3.msra.mxu1 %v401_v35  ;;  %v3798_v22 = vpop.permute.xlu1 %3797 }
 0x511   : > { %6686 = vmatprep.subr.mxu1 %v401_v35  ;;  %v3612_v24 = vpop.permute.xlu0 %3611 }
 0x514   : > { %v3701_v30 = vpop.permute.xlu1 %3700 }
 0x515   : > { %v3889_v33 = vpop.permute.xlu0 %3888 }
 0x519   : > { %v3796_v32 = vpop.permute.xlu0 %3795 }
 0x5c3   : > { %v6649_v9 = vpop.f32.mrf.mxu0 }
 0x5c5   : > { %v2685_v10 = vpop.f32.mrf.mxu0 }
 0x5c6   : > { %6673 = vmatprep.mubr.msk.f32.mxu0 %vm1377_vm1, %v2685_v10 }
 0x5c7   : > { %v6656_v19 = vpop.f32.mrf.mxu1  ;;  %6674 = vmatmul.mubr.msk.f32.vlgmr.msra.gmra.mxu0 %vm1377_vm1, %v6649_v9 }
 0x5c8   : > { %6682 = vmatpush3.msra.mxu0 %v401_v35 }
 0x5c9   : > { %v2774_v23 = vpop.f32.mrf.mxu1  ;;  %6691 = vmatprep.subr.mxu0 %v400_v20 }
 0x5ca   : > { %6678 = vmatprep.mubr.msk.f32.mxu1 %vm1377_vm1, %v2774_v23 }
 0x5cb   : > { %v6663_v26 = vpop.f32.mrf.mxu0  ;;  %6679 = vmatmul.mubr.msk.f32.vlgmr.msra.gmra.mxu1 %vm1377_vm1, %v6656_v19 }
 0x5cc   : > { %6687 = vmatpush3.msra.mxu1 %v401_v35 }
 0x5cd   : > { %v2863_v25 = vpop.f32.mrf.mxu0  ;;  %6696 = vmatprep.subr.mxu1 %v400_v20 }
 0x5ce   : > { %6683 = vmatprep.mubr.msk.f32.mxu0 %vm1377_vm1, %v2863_v25 }
 0x5cf   : > { %v6670_v28 = vpop.f32.mrf.mxu1  ;;  %6684 = vmatmul.mubr.msk.f32.vlgmr.msra.gmra.mxu0 %vm1377_vm1, %v6663_v26 }
 0x5d0   : > { %6693 = vmatprep.mubr.msk.f32.mxu0 %vm1377_vm1, %v7404_v13  ;;  %6692 = vmatpush3.msra.mxu0 %v400_v20  ;;  %v3703_v13 = vpop.permute.xlu1 %3702 }
 0x5d1   : > { %v2952_v29 = vpop.f32.mrf.mxu1  ;;  %6701 = vmatprep.subr.mxu0 %v400_v20 }
 0x5d2   : > { %6688 = vmatprep.mubr.msk.f32.mxu1 %vm1377_vm1, %v2952_v29 }
 0x5d3   : > { %6689 = vmatmul.mubr.msk.f32.vlgmr.msra.gmra.mxu1 %vm1377_vm1, %v6670_v28  ;;  %6694 = vmatmul.mubr.msk.f32.vlgmr.msra.gmra.mxu0 %vm1377_vm1, %v7402_v12 }
 0x5d4   : > { %6697 = vmatpush3.msra.mxu1 %v400_v20  ;;  %6702 = vmatpush3.msra.mxu0 %v400_v20  ;;  %v3887_v12 = vpop.permute.xlu1 %3886 }
 0x5d5   : > { %6698 = vmatprep.mubr.msk.f32.mxu1 %vm1377_vm1, %v7410_v16  ;;  %6703 = vmatprep.mubr.msk.f32.mxu0 %vm1377_vm1, %v7412_v17 }
 0x5d6   : > { %6711 = vmatprep.subr.msk.mxu0 %vm1377_vm1, %v3616_v0  ;;  %6706 = vmatprep.subr.mxu1 %v400_v20 }
 0x5d7   : > { %6699 = vmatmul.mubr.msk.f32.vlgmr.msra.gmra.mxu1 %vm1377_vm1, %v7406_v14  ;;  %6704 = vmatmul.mubr.msk.f32.vlgmr.msra.gmra.mxu0 %vm1377_vm1, %v7408_v15  ;;  %v3792_v14 = vpop.permute.xlu0 %3791 }
 0x5d8   : > { %6707 = vmatpush3.msra.mxu1 %v400_v20  ;;  %6712 = vmatpush3.xpose.msk.msra.mxu0 %vm1377_vm1, %v3616_v0  ;;  %v3794_v15 = vpop.permute.xlu1 %3793 }
 0x5d9   : > { %6708 = vmatprep.mubr.msk.f32.mxu1 %vm1377_vm1, %v7417_v21  ;;  %6713 = vmatprep.subr.msk.mxu0 %vm1377_vm1, %v3614_v7 }
 0x5da   : > { %6715 = vmatprep.mubr.msk.f32.mxu0 %vm1377_vm1, %v3610_v11  ;;  %6718 = vmatprep.subr.msk.mxu1 %vm1377_vm1, %v3707_v3 }
 0x5db   : > { %6709 = vmatmul.mubr.msk.f32.vlgmr.msra.gmra.mxu1 %vm1377_vm1, %v7414_v18  ;;  %v3883_v16 = vpop.permute.xlu0 %3882 }
 0x5dc   : > { %6714 = vmatpush3.xpose.msk.msra.mxu0 %vm1377_vm1, %v3614_v7  ;;  %6719 = vmatpush3.xpose.msk.msra.mxu1 %vm1377_vm1, %v3707_v3  ;;  %v3885_v17 = vpop.permute.xlu1 %3884 }
 0x5dd   : > { %6720 = vmatprep.subr.msk.mxu1 %vm1377_vm1, %v3705_v2  ;;  %6722 = vmatprep.mubr.msk.f32.mxu1 %vm1377_vm1, %v3701_v30 }
 0x5de   : > { %6725 = vmatprep.subr.msk.mxu0 %vm1377_vm1, %v3798_v22 }
 0x5df   : > { %6716 = vmatmul.mubr.msk.f32.vlgmr.msra.gmra.mxu0 %vm1377_vm1, %v3612_v24 }
 0x5e0   : > { %6721 = vmatpush3.xpose.msk.msra.mxu1 %vm1377_vm1, %v3705_v2  ;;  %6726 = vmatpush3.xpose.msk.msra.mxu0 %vm1377_vm1, %v3798_v22 }
 0x5e1   : > { %6729 = vmatprep.mubr.msk.f32.mxu0 %vm1377_vm1, %v3792_v14  ;;  %6727 = vmatprep.subr.msk.mxu0 %vm1377_vm1, %v3796_v32 }
 0x5e2   : > { %6732 = vmatprep.subr.msk.mxu1 %vm1377_vm1, %v3889_v33 }
 0x5e3   : > { %6723 = vmatmul.mubr.msk.f32.vlgmr.msra.gmra.mxu1 %vm1377_vm1, %v3703_v13 }
 0x5e4   : > { %6728 = vmatpush3.xpose.msk.msra.mxu0 %vm1377_vm1, %v3796_v32  ;;  %6733 = vmatpush3.xpose.msk.msra.mxu1 %vm1377_vm1, %v3889_v33 }
 0x5e5   : > { %6736 = vmatprep.mubr.msk.f32.mxu1 %vm1377_vm1, %v3883_v16  ;;  %6734 = vmatprep.subr.msk.mxu1 %vm1377_vm1, %v3887_v12 }
 0x5e7   : > { %6730 = vmatmul.mubr.msk.f32.vlgmr.msra.gmra.mxu0 %vm1377_vm1, %v3794_v15 }
 0x5e8   : > { %6735 = vmatpush3.xpose.msk.msra.mxu1 %vm1377_vm1, %v3887_v12 }
 0x5eb   : > { %6737 = vmatmul.mubr.msk.f32.vlgmr.msra.gmra.mxu1 %vm1377_vm1, %v3885_v17 }
 0x687   : > { %v6675_v18 = vpop.f32.mrf.mxu0 }
 0x689   : > { %v3033_v21 = vpop.f32.mrf.mxu0 }
 0x68b   : > { %v6680_v60 = vpop.f32.mrf.mxu1 }
 0x68d   : > { %v3114_v34 = vpop.f32.mrf.mxu1 }
 0x68f   : > { %v6685_v61 = vpop.f32.mrf.mxu0 }
 0x691   : > { %v3195_v62 = vpop.f32.mrf.mxu0 }
 0x693   : > { %v6690_v63 = vpop.f32.mrf.mxu1  ;;  %v6695_v27 = vpop.f32.mrf.mxu0 }
 0x694   : > { %v7576_v5 = vadd.f32 %v6695_v27, %v6675_v18 }
 0x695   : > { %v3276_v6 = vpop.f32.mrf.mxu1  ;;  %v3357_v1 = vpop.f32.mrf.mxu0 }
 0x696   : > { %v7578_v31 = vadd.f32 %v3357_v1, %v3033_v21 }
 0x697   : > { %v6700_v4 = vpop.f32.mrf.mxu1  ;;  %v6705_v8 = vpop.f32.mrf.mxu0 }
 0x698   : > { %v7580_v35 = vadd.f32 %v6700_v4, %v6680_v60  ;;  %v7582_v0 = vadd.f32 %v6705_v8, %v6685_v61 }
 0x699   : > { %v3438_v3 = vpop.f32.mrf.mxu1  ;;  %v3519_v7 = vpop.f32.mrf.mxu0 }
 0x69a   : > { %v7584_v9 = vadd.f32 %v3438_v3, %v3114_v34  ;;  %v7586_v10 = vadd.f32 %v3519_v7, %v3195_v62 }
 0x69b   : > { %v6710_v2 = vpop.f32.mrf.mxu1 }
 0x69c   : > { %v7588_v11 = vadd.f32 %v6710_v2, %v6690_v63 }
 0x69d   : > { %v3600_v20 = vpop.f32.mrf.mxu1 }
 0x69e   : > { %v7590_v19 = vadd.f32 %v3600_v20, %v3276_v6 }
 0x69f   : > { %v6717_v23 = vpop.f32.mrf.mxu0 }
 0x6a0   : > { %v3976_v26 = vsel %vm1730_vm3, %v6717_v23, -inf }
 0x6a1   : > { %3977 = vmax.xlane.f32.xlu1 %v3976_v26  ;;  %v3691_v25 = vpop.f32.mrf.mxu0 }
 0x6a2   : > { %v3973_v29 = vsel %vm1726_vm4, %v3691_v25, -inf }
 0x6a3   : > { %v6724_v22 = vpop.f32.mrf.mxu1 }
 0x6a4   : > { %v3982_v24 = vsel %vm1730_vm3, %v6724_v22, -inf }
 0x6a5   : > { %3983 = vmax.xlane.f32.xlu0 %v3982_v24  ;;  %v3782_v33 = vpop.f32.mrf.mxu1 }
 0x6a6   : > { %v3979_v32 = vsel %vm1726_vm4, %v3782_v33, -inf }
 0x6a7   : > { %v6731_v28 = vpop.f32.mrf.mxu0 }
 0x6a8   : > { %v3988_v30 = vsel %vm1730_vm3, %v6731_v28, -inf }
 0x6a9   : > { %3974 = vmax.xlane.f32.xlu0 %v3973_v29  ;;  %3989 = vmax.xlane.f32.xlu1 %v3988_v30  ;;  %v3873_v14 = vpop.f32.mrf.mxu0 }
 0x6aa   : > { %v3985_v15 = vsel %vm1726_vm4, %v3873_v14, -inf }
 0x6ab   : > { %v6738_v13 = vpop.f32.mrf.mxu1 }
 0x6ac   : > { %v3994_v12 = vsel %vm1730_vm3, %v6738_v13, -inf }
 0x6ad   : > { %3980 = vmax.xlane.f32.xlu0 %v3979_v32  ;;  %3995 = vmax.xlane.f32.xlu1 %v3994_v12  ;;  %v3964_v16 = vpop.f32.mrf.mxu1 }
 0x6ae   : > { %v3991_v17 = vsel %vm1726_vm4, %v3964_v16, -inf }
 0x6b1   : > { %3986 = vmax.xlane.f32.xlu0 %v3985_v15 }
 0x6b5   : > { %3992 = vmax.xlane.f32.xlu0 %v3991_v17 }
 0x6be   : > { %4151 = vrot.lane.b32.xlu1 %v7259_v54, %s7011_s23 }
 0x6c2   : > { %4061 = vrot.lane.b32.xlu1 %v7254_v53, %s7011_s23 }
 0x6c6   : > { %4149 = vrot.lane.b32.xlu1 %v7264_v55, %s7011_s23 }
 0x6ca   : > { %4327 = vrot.lane.b32.xlu1 %v7274_v57, %s7011_s23 }
 0x6cb   : > { %4063 = vrot.lane.b32.xlu0 %v7250_v52, %s7011_s23 }
 0x6cf   : > { %4239 = vrot.lane.b32.xlu0 %v7270_v56, %s7011_s23 }
 0x72a   : > { %v3978_v18 = vpop.xlane.xlu1 %3977 }
 0x72b   : > { %v3998_v21 = vsub.f32 %v6717_v23, %v3978_v18 }
 0x72d   : > { %v4007_v60 = vmul.f32 1.442695, %v3998_v21 }
 0x72e   : > { %v3984_v61 = vpop.xlane.xlu0 %3983 }
 0x72f   : > { %6938 = vpow2.f32 %v4007_v60  ;;  %v4000_v34 = vsub.f32 %v6724_v22, %v3984_v61 }
 0x731   : > { %v4011_v62 = vmul.f32 1.442695, %v4000_v34 }
 0x732   : > { %v3990_v63 = vpop.xlane.xlu1 %3989  ;;  %v3975_v27 = vpop.xlane.xlu0 %3974 }
 0x733   : > { %6940 = vpow2.f32 %v4011_v62  ;;  %v4002_v6 = vsub.f32 %v6731_v28, %v3990_v63  ;;  %v3997_v1 = vsub.f32 %v3691_v25, %v3975_v27 }
 0x735   : > { %v4015_v4 = vmul.f32 1.442695, %v4002_v6  ;;  %v4005_v8 = vmul.f32 1.442695, %v3997_v1 }
 0x736   : > { %v3996_v3 = vpop.xlane.xlu1 %3995  ;;  %v3981_v7 = vpop.xlane.xlu0 %3980 }
 0x737   : > { %6942 = vpow2.f32 %v4015_v4  ;;  %v4004_v2 = vsub.f32 %v6738_v13, %v3996_v3  ;;  %v3999_v20 = vsub.f32 %v3782_v33, %v3981_v7 }
 0x738   : > { %6944 = vpow2.f32 %v4005_v8 }
 0x739   : > { %v4019_v26 = vmul.f32 1.442695, %v4004_v2  ;;  %v4009_v23 = vmul.f32 1.442695, %v3999_v20 }
 0x73a   : > { %v4152_v24 = vpop.permute.xlu1 %4151  ;;  %v3987_v29 = vpop.xlane.xlu0 %3986 }
 0x73b   : > { %6946 = vpow2.f32 %v4019_v26  ;;  %v4001_v22 = vsub.f32 %v3873_v14, %v3987_v29  ;;  %6746 = vmatprep.subr.msk.mxu1 %vm1822_vm2, %v4152_v24 }
 0x73c   : > { %v7613_v30 = vpop.eup %6938  ;;  %6948 = vpow2.f32 %v4009_v23  ;;  %6747 = vmatpush3.msk.msra.mxu1 %vm1822_vm2, %v4152_v24 }
 0x73d   : > { %v4013_v25 = vmul.f32 1.442695, %v4001_v22  ;;  %v4024_v28 = vsel %vm1730_vm3, %v7613_v30, 0.0 }
 0x73e   : > { %4025 = vadd.xlane.f32.xlu1 %v4024_v28  ;;  %v4062_v33 = vpop.permute.xlu1 %4061  ;;  %v3993_v13 = vpop.xlane.xlu0 %3992 }
 0x73f   : > { %6950 = vpow2.f32 %v4013_v25  ;;  %v4003_v32 = vsub.f32 %v3964_v16, %v3993_v13 }
 0x740   : > { %v7618_v12 = vpop.eup %6940 }
 0x741   : > { %v4017_v15 = vmul.f32 1.442695, %v4003_v32  ;;  %v4030_v14 = vsel %vm1730_vm3, %v7618_v12, 0.0 }
 0x742   : > { %v4150_v17 = vpop.permute.xlu1 %4149  ;;  %4031 = vadd.xlane.f32.xlu1 %v4030_v14  ;;  %v4064_v18 = vpop.permute.xlu0 %4063 }
 0x743   : > { %6952 = vpow2.f32 %v4017_v15  ;;  %6739 = vmatprep.subr.msk.mxu0 %vm1822_vm2, %v4064_v18  ;;  %6748 = vmatprep.subr.mxu1 %v4150_v17 }
 0x744   : > { %v7623_v21 = vpop.eup %6942  ;;  %6740 = vmatpush3.msk.msra.mxu0 %vm1822_vm2, %v4064_v18  ;;  %6749 = vmatpush3.msra.mxu1 %v4150_v17 }
 0x745   : > { %v6945_v60 = vpop.eup %6944  ;;  %6741 = vmatprep.subr.mxu0 %v4062_v33  ;;  %v4036_v16 = vsel %vm1730_vm3, %v7623_v21, 0.0 }
 0x746   : > { %v7628_v61 = vpop.permute.xlu1 %4327  ;;  %4037 = vadd.xlane.f32.xlu1 %v4036_v16  ;;  %v4021_v34 = vsel %vm1726_vm4, %v6945_v60, 0.0  ;;  %6742 = vmatpush3.msra.mxu0 %v4062_v33  ;;  %v4240_v62 = vpop.permute.xlu0 %4239  ;;  %v402_v33 = vld [vmem:[%s7868_s6 + $0x10] sm:$0xff] }
 0x747   : > { %4022 = vadd.xlane.f32.xlu0 %v4021_v34  ;;  %6753 = vmatprep.subr.msk.mxu0 %vm1822_vm2, %v4240_v62 }
 0x748   : > { %v7632_v63 = vpop.eup %6946  ;;  %6760 = vmatprep.subr.msk.mxu1 %vm1822_vm2, %v7628_v61 }
 0x749   : > { %v6949_v27 = vpop.eup %6948  ;;  %v4042_v6 = vsel %vm1730_vm3, %v7632_v63, 0.0 }
 0x74a   : > { %4043 = vadd.xlane.f32.xlu1 %v4042_v6  ;;  %v4027_v1 = vsel %vm1726_vm4, %v6949_v27, 0.0 }
 0x74b   : > { %4028 = vadd.xlane.f32.xlu0 %v4027_v1 }
 0x74c   : > { %v6951_v4 = vpop.eup %6950 }
 0x74d   : > { %v4033_v8 = vsel %vm1726_vm4, %v6951_v4, 0.0 }
 0x74f   : > { %4034 = vadd.xlane.f32.xlu0 %v4033_v8 }
 0x750   : > { %v7640_v3 = vpop.eup %6952 }
 0x751   : > { %v4039_v7 = vsel %vm1726_vm4, %v7640_v3, 0.0 }
 0x753   : > { %4040 = vadd.xlane.f32.xlu0 %v4039_v7 }
 0x75b   : > { %4325 = vrot.lane.b32.xlu1 %v7278_v58, %s7011_s23 }
 0x75f   : > { %4842 = vrot.lane.b32.xlu1 %v7192_v45, %s7012_s29 }
 0x763   : > { %4840 = vrot.lane.b32.xlu1 %v7204_v47, %s7012_s29 }
 0x767   : > { %4933 = vrot.lane.b32.xlu1 %v7218_v48, %s7012_s29 }
 0x769   : > { %4237 = vrot.lane.b32.xlu0 %v7280_v59, %s7011_s23 }
 0x76b   : > { %4836 = vrot.lane.b32.xlu1 %v7178_v39, %s7012_s29 }
 0x76d   : > { %4751 = vrot.lane.b32.xlu0 %v7190_v44, %s7012_s29 }
 0x76f   : > { %4838 = vrot.lane.b32.xlu1 %v7174_v38, %s7012_s29 }
 0x771   : > { %4749 = vrot.lane.b32.xlu0 %v7198_v46, %s7012_s29 }
 0x773   : > { %5022 = vrot.lane.b32.xlu1 %v7236_v51, %s7012_s29 }
 0x775   : > { %4745 = vrot.lane.b32.xlu0 %v7172_v37, %s7012_s29 }
 0x777   : > { %4929 = vrot.lane.b32.xlu1 %v7184_v41, %s7012_s29 }
 0x779   : > { %4747 = vrot.lane.b32.xlu0 %v7170_v36, %s7012_s29 }
 0x77b   : > { %5020 = vrot.lane.b32.xlu1 %v7182_v40, %s7012_s29 }
 0x77d   : > { %5024 = vrot.lane.b32.xlu0 %v7220_v49, %s7012_s29 }
 0x781   : > { %4931 = vrot.lane.b32.xlu0 %v7230_v50, %s7012_s29 }
 0x785   : > { %4927 = vrot.lane.b32.xlu0 %v7188_v43, %s7012_s29 }
 0x789   : > { %5018 = vrot.lane.b32.xlu0 %v7186_v42, %s7012_s29 }
 0x7c7   : > { %v4026_v37 = vpop.xlane.xlu1 %4025 }
 0x7c8   : > { %6954 = vrcp.f32 %v4026_v37 }
 0x7cb   : > { %v4032_v38 = vpop.xlane.xlu1 %4031 }
 0x7cf   : > { %v4038_v36 = vpop.xlane.xlu1 %4037 }
 0x7d0   : > { %v4023_v39 = vpop.xlane.xlu0 %4022 }
 0x7d1   : > { %6956 = vrcp.f32 %v4023_v39 }
 0x7d2   : > { %6958 = vrcp.f32 %v4032_v38 }
 0x7d3   : > { %v4044_v44 = vpop.xlane.xlu1 %4043 }
 0x7d4   : > { %v4029_v40 = vpop.xlane.xlu0 %4028 }
 0x7d5   : > { %6960 = vrcp.f32 %v4029_v40  ;;  %v6955_v46 = vpop.eup %6954 }
 0x7d6   : > { %6962 = vrcp.f32 %v4038_v36  ;;  %v4054_v42 = vmul.f32 %v6955_v46, %v7613_v30 }
 0x7d7   : > { %v4326_v23 = vpop.permute.xlu1 %4325 }
 0x7d8   : > { %v4035_v41 = vpop.xlane.xlu0 %4034 }
 0x7d9   : > { %6964 = vrcp.f32 %v4035_v41 }
 0x7da   : > { %6966 = vrcp.f32 %v4044_v44 }
 0x7db   : > { %v4843_v32 = vpop.permute.xlu1 %4842 }
 0x7dc   : > { %v4041_v45 = vpop.xlane.xlu0 %4040 }
 0x7dd   : > { %6968 = vrcp.f32 %v4041_v45 }
 0x7de   : > { %v6957_v43 = vpop.eup %6956 }
 0x7df   : > { %v4053_v47 = vmul.f32 %v6957_v43, %v6945_v60  ;;  %v6959_v48 = vpop.eup %6958  ;;  %v4841_v15 = vpop.permute.xlu1 %4840 }
 0x7e0   : > { %v4238_v50 = vpop.permute.xlu0 %4237  ;;  %v4056_v2 = vmul.f32 %v6959_v48, %v7618_v12 }
 0x7e1   : > { %6743 = vmatprep.mubr.msk.f32.mxu0 %vm1726_vm4, %v4053_v47 }
 0x7e2   : > { %v6961_v49 = vpop.eup %6960  ;;  %6744 = vmatmul.mubr.msk.f32.vlgmr.msra.gmra.mxu0 %vm1726_vm4, %v4054_v42 }
 0x7e3   : > { %6754 = vmatpush3.msk.msra.mxu0 %vm1822_vm2, %v4240_v62  ;;  %v4055_v51 = vmul.f32 %v6961_v49, %v6949_v27  ;;  %v6963_v20 = vpop.eup %6962  ;;  %v4934_v18 = vpop.permute.xlu1 %4933 }
 0x7e4   : > { %6755 = vmatprep.subr.mxu0 %v4238_v50  ;;  %v4058_v29 = vmul.f32 %v6963_v20, %v7623_v21  ;;  %v4752_v13 = vpop.permute.xlu0 %4751 }
 0x7e5   : > { %6756 = vmatpush3.msra.mxu0 %v4238_v50  ;;  %6750 = vmatprep.mubr.msk.f32.mxu1 %vm1726_vm4, %v4055_v51 }
 0x7e6   : > { %v6965_v26 = vpop.eup %6964  ;;  %6751 = vmatmul.mubr.msk.f32.vlgmr.msra.gmra.mxu1 %vm1726_vm4, %v4056_v2  ;;  %6767 = vmatprep.subr.mxu0 %v402_v33 }
 0x7e7   : > { %6761 = vmatpush3.msk.msra.mxu1 %vm1822_vm2, %v7628_v61  ;;  %v4057_v24 = vmul.f32 %v6965_v26, %v6951_v4  ;;  %v6967_v22 = vpop.eup %6966  ;;  %v4837_v34 = vpop.permute.xlu1 %4836 }
 0x7e8   : > { %6762 = vmatprep.subr.mxu1 %v4326_v23  ;;  %v4060_v28 = vmul.f32 %v6967_v22, %v7632_v63  ;;  %v4750_v12 = vpop.permute.xlu0 %4749 }
 0x7e9   : > { %6763 = vmatpush3.msra.mxu1 %v4326_v23  ;;  %6757 = vmatprep.mubr.msk.f32.mxu0 %vm1726_vm4, %v4057_v24 }
 0x7ea   : > { %v6969_v30 = vpop.eup %6968  ;;  %6758 = vmatmul.mubr.msk.f32.vlgmr.msra.gmra.mxu0 %vm1726_vm4, %v4058_v29  ;;  %6772 = vmatprep.subr.mxu1 %v402_v33 }
 0x7eb   : > { %v4059_v25 = vmul.f32 %v6969_v30, %v7640_v3  ;;  %6768 = vmatpush3.msra.mxu0 %v402_v33  ;;  %v4839_v1 = vpop.permute.xlu1 %4838 }
 0x7ec   : > { %6777 = vmatprep.subr.mxu0 %v402_v33  ;;  %v4746_v14 = vpop.permute.xlu0 %4745 }
 0x7ed   : > { %6764 = vmatprep.mubr.msk.f32.mxu1 %vm1726_vm4, %v4059_v25 }
 0x7ee   : > { %6765 = vmatmul.mubr.msk.f32.vlgmr.msra.gmra.mxu1 %vm1726_vm4, %v4060_v28 }
 0x7ef   : > { %6773 = vmatpush3.msra.mxu1 %v402_v33  ;;  %v5023_v3 = vpop.permute.xlu1 %5022 }
 0x7f0   : > { %6782 = vmatprep.subr.mxu1 %v402_v33  ;;  %v4748_v21 = vpop.permute.xlu0 %4747 }
 0x7f3   : > { %v4930_v37 = vpop.permute.xlu1 %4929 }
 0x7f4   : > { %v5025_v62 = vpop.permute.xlu0 %5024 }
 0x7f7   : > { %v5021_v39 = vpop.permute.xlu1 %5020 }
 0x7f8   : > { %v4932_v4 = vpop.permute.xlu0 %4931 }
 0x7fc   : > { %v4928_v7 = vpop.permute.xlu0 %4927 }
 0x800   : > { %v5019_v38 = vpop.permute.xlu0 %5018 }
 0x8a2   : > { %v6745_v17 = vpop.f32.mrf.mxu0 }
 0x8a4   : > { %v4140_v60 = vpop.f32.mrf.mxu0 }
 0x8a5   : > { %6769 = vmatprep.mubr.msk.f32.mxu0 %vm1377_vm1, %v4140_v60 }
 0x8a6   : > { %v6752_v16 = vpop.f32.mrf.mxu1  ;;  %6770 = vmatmul.mubr.msk.f32.vlgmr.msra.gmra.mxu0 %vm1377_vm1, %v6745_v17 }
 0x8a7   : > { %6778 = vmatpush3.msra.mxu0 %v402_v33 }
 0x8a8   : > { %6787 = vmatprep.subr.msk.mxu0 %vm1377_vm1, %v4752_v13  ;;  %v4228_v61 = vpop.f32.mrf.mxu1 }
 0x8a9   : > { %6774 = vmatprep.mubr.msk.f32.mxu1 %vm1377_vm1, %v4228_v61 }
 0x8aa   : > { %v6759_v63 = vpop.f32.mrf.mxu0  ;;  %6775 = vmatmul.mubr.msk.f32.vlgmr.msra.gmra.mxu1 %vm1377_vm1, %v6752_v16 }
 0x8ab   : > { %6783 = vmatpush3.msra.mxu1 %v402_v33 }
 0x8ac   : > { %6794 = vmatprep.subr.msk.mxu1 %vm1377_vm1, %v4843_v32  ;;  %v4316_v27 = vpop.f32.mrf.mxu0 }
 0x8ad   : > { %6779 = vmatprep.mubr.msk.f32.mxu0 %vm1377_vm1, %v4316_v27 }
 0x8ae   : > { %v6766_v6 = vpop.f32.mrf.mxu1  ;;  %6780 = vmatmul.mubr.msk.f32.vlgmr.msra.gmra.mxu0 %vm1377_vm1, %v6759_v63 }
 0x8af   : > { %6788 = vmatpush3.xpose.msk.msra.mxu0 %vm1377_vm1, %v4752_v13  ;;  %6791 = vmatprep.mubr.msk.f32.mxu0 %vm1377_vm1, %v4746_v14 }
 0x8b0   : > { %6789 = vmatprep.subr.msk.mxu0 %vm1377_vm1, %v4750_v12  ;;  %v4404_v8 = vpop.f32.mrf.mxu1 }
 0x8b1   : > { %6784 = vmatprep.mubr.msk.f32.mxu1 %vm1377_vm1, %v4404_v8 }
 0x8b2   : > { %6785 = vmatmul.mubr.msk.f32.vlgmr.msra.gmra.mxu1 %vm1377_vm1, %v6766_v6 }
 0x8b3   : > { %6790 = vmatpush3.xpose.msk.msra.mxu0 %vm1377_vm1, %v4750_v12  ;;  %6795 = vmatpush3.xpose.msk.msra.mxu1 %vm1377_vm1, %v4843_v32 }
 0x8b4   : > { %6796 = vmatprep.subr.msk.mxu1 %vm1377_vm1, %v4841_v15  ;;  %6798 = vmatprep.mubr.msk.f32.mxu1 %vm1377_vm1, %v4837_v34 }
 0x8b5   : > { %6801 = vmatprep.subr.msk.mxu0 %vm1377_vm1, %v4934_v18 }
 0x8b6   : > { %6792 = vmatmul.mubr.msk.f32.vlgmr.msra.gmra.mxu0 %vm1377_vm1, %v4748_v21 }
 0x8b7   : > { %6797 = vmatpush3.xpose.msk.msra.mxu1 %vm1377_vm1, %v4841_v15  ;;  %6802 = vmatpush3.xpose.msk.msra.mxu0 %vm1377_vm1, %v4934_v18 }
 0x8b8   : > { %6805 = vmatprep.mubr.msk.f32.mxu0 %vm1377_vm1, %v4928_v7  ;;  %6803 = vmatprep.subr.msk.mxu0 %vm1377_vm1, %v4932_v4 }
 0x8b9   : > { %6808 = vmatprep.subr.msk.mxu1 %vm1377_vm1, %v5025_v62 }
 0x8ba   : > { %6799 = vmatmul.mubr.msk.f32.vlgmr.msra.gmra.mxu1 %vm1377_vm1, %v4839_v1 }
 0x8bb   : > { %6804 = vmatpush3.xpose.msk.msra.mxu0 %vm1377_vm1, %v4932_v4  ;;  %6809 = vmatpush3.xpose.msk.msra.mxu1 %vm1377_vm1, %v5025_v62 }
 0x8bc   : > { %6812 = vmatprep.mubr.msk.f32.mxu1 %vm1377_vm1, %v5019_v38  ;;  %6810 = vmatprep.subr.msk.mxu1 %vm1377_vm1, %v5023_v3 }
 0x8be   : > { %6806 = vmatmul.mubr.msk.f32.vlgmr.msra.gmra.mxu0 %vm1377_vm1, %v4930_v37 }
 0x8bf   : > { %6811 = vmatpush3.xpose.msk.msra.mxu1 %vm1377_vm1, %v5023_v3 }
 0x8c2   : > { %6813 = vmatmul.mubr.msk.f32.vlgmr.msra.gmra.mxu1 %vm1377_vm1, %v5021_v39 }
 0x966   : > { %v6771_v36 = vpop.f32.mrf.mxu0 }
 0x967   : > { %v7732_v40 = vadd.f32 %v6771_v36, %v7576_v5 }
 0x968   : > { %v4485_v41 = vpop.f32.mrf.mxu0 }
 0x969   : > { %v7735_v44 = vadd.f32 %v4485_v41, %v7578_v31 }
 0x96a   : > { %v6776_v45 = vpop.f32.mrf.mxu1 }
 0x96b   : > { %v7738_v46 = vadd.f32 %v6776_v45, %v7580_v35 }
 0x96c   : > { %v4566_v43 = vpop.f32.mrf.mxu1 }
 0x96d   : > { %v7741_v47 = vadd.f32 %v4566_v43, %v7584_v9 }
 0x96e   : > { %v6781_v42 = vpop.f32.mrf.mxu0 }
 0x96f   : > { %v7744_v48 = vadd.f32 %v6781_v42, %v7582_v0 }
 0x970   : > { %v4647_v49 = vpop.f32.mrf.mxu0 }
 0x971   : > { %v7747_v5 = vadd.f32 %v4647_v49, %v7586_v10 }
 0x972   : > { %v6786_v50 = vpop.f32.mrf.mxu1 }
 0x973   : > { %v7750_v31 = vadd.f32 %v6786_v50, %v7588_v11 }
 0x974   : > { %v4728_v51 = vpop.f32.mrf.mxu1 }
 0x975   : > { %v7753_v35 = vadd.f32 %v4728_v51, %v7590_v19 }
 0x976   : > { %v6793_v2 = vpop.f32.mrf.mxu0 }
 0x977   : > { %v5112_v9 = vsel %vm1730_vm3, %v6793_v2, -inf }
 0x978   : > { %5113 = vmax.xlane.f32.xlu1 %v5112_v9  ;;  %v4827_v26 = vpop.f32.mrf.mxu0 }
 0x979   : > { %v5109_v10 = vsel %vm1726_vm4, %v4827_v26, -inf }
 0x97a   : > { %v6800_v20 = vpop.f32.mrf.mxu1 }
 0x97b   : > { %v5118_v0 = vsel %vm1730_vm3, %v6800_v20, -inf }
 0x97c   : > { %5119 = vmax.xlane.f32.xlu0 %v5118_v0  ;;  %v4918_v11 = vpop.f32.mrf.mxu1 }
 0x97d   : > { %v5115_v19 = vsel %vm1726_vm4, %v4918_v11, -inf }
 0x97e   : > { %v6807_v23 = vpop.f32.mrf.mxu0 }
 0x97f   : > { %v5124_v24 = vsel %vm1730_vm3, %v6807_v23, -inf }
 0x980   : > { %5110 = vmax.xlane.f32.xlu0 %v5109_v10  ;;  %5125 = vmax.xlane.f32.xlu1 %v5124_v24  ;;  %v5009_v30 = vpop.f32.mrf.mxu0 }
 0x981   : > { %v5121_v25 = vsel %vm1726_vm4, %v5009_v30, -inf }
 0x982   : > { %v6814_v29 = vpop.f32.mrf.mxu1 }
 0x983   : > { %v5130_v22 = vsel %vm1730_vm3, %v6814_v29, -inf }
 0x984   : > { %5116 = vmax.xlane.f32.xlu0 %v5115_v19  ;;  %5131 = vmax.xlane.f32.xlu1 %v5130_v22  ;;  %v5100_v28 = vpop.f32.mrf.mxu1 }
 0x985   : > { %v5127_v33 = vsel %vm1726_vm4, %v5100_v28, -inf }
 0x988   : > { %5122 = vmax.xlane.f32.xlu0 %v5121_v25 }
 0x98c   : > { %5128 = vmax.xlane.f32.xlu0 %v5127_v33 }
 0x995   : > { %5287 = vrot.lane.b32.xlu1 %v7259_v54, %s7012_s29 }
 0x999   : > { %5197 = vrot.lane.b32.xlu1 %v7254_v53, %s7012_s29 }
 0x99d   : > { %5285 = vrot.lane.b32.xlu1 %v7264_v55, %s7012_s29 }
 0x9a1   : > { %5463 = vrot.lane.b32.xlu1 %v7274_v57, %s7012_s29 }
 0x9a2   : > { %5199 = vrot.lane.b32.xlu0 %v7250_v52, %s7012_s29 }
 0x9a6   : > { %5375 = vrot.lane.b32.xlu0 %v7270_v56, %s7012_s29 }
 0xa01   : > { %v5114_v13 = vpop.xlane.xlu1 %5113 }
 0xa02   : > { %v5134_v32 = vsub.f32 %v6793_v2, %v5114_v13 }
 0xa04   : > { %v5143_v12 = vmul.f32 1.442695, %v5134_v32 }
 0xa05   : > { %v5120_v15 = vpop.xlane.xlu0 %5119 }
 0xa06   : > { %6970 = vpow2.f32 %v5143_v12  ;;  %v5136_v54 = vsub.f32 %v6800_v20, %v5120_v15 }
 0xa08   : > { %v5147_v14 = vmul.f32 1.442695, %v5136_v54 }
 0xa09   : > { %v5126_v53 = vpop.xlane.xlu1 %5125  ;;  %v5111_v17 = vpop.xlane.xlu0 %5110 }
 0xa0a   : > { %6972 = vpow2.f32 %v5147_v14  ;;  %v5138_v55 = vsub.f32 %v6807_v23, %v5126_v53  ;;  %v5133_v18 = vsub.f32 %v4827_v26, %v5111_v17 }
 0xa0c   : > { %v5151_v21 = vmul.f32 1.442695, %v5138_v55  ;;  %v5141_v57 = vmul.f32 1.442695, %v5133_v18 }
 0xa0d   : > { %v5132_v60 = vpop.xlane.xlu1 %5131  ;;  %v5117_v16 = vpop.xlane.xlu0 %5116 }
 0xa0e   : > { %6974 = vpow2.f32 %v5151_v21  ;;  %v5140_v52 = vsub.f32 %v6814_v29, %v5132_v60  ;;  %v5135_v61 = vsub.f32 %v4918_v11, %v5117_v16 }
 0xa0f   : > { %6976 = vpow2.f32 %v5141_v57 }
 0xa10   : > { %v5155_v56 = vmul.f32 1.442695, %v5140_v52  ;;  %v5145_v34 = vmul.f32 1.442695, %v5135_v61 }
 0xa11   : > { %v5288_v62 = vpop.permute.xlu1 %5287  ;;  %v5123_v63 = vpop.xlane.xlu0 %5122 }
 0xa12   : > { %6978 = vpow2.f32 %v5155_v56  ;;  %v5137_v27 = vsub.f32 %v5009_v30, %v5123_v63  ;;  %6822 = vmatprep.subr.msk.mxu1 %vm1822_vm2, %v5288_v62  ;;  %v403_v56 = vld [vmem:[%s7868_s6 + $0x18] sm:$0xff] }
 0xa13   : > { %v7776_v6 = vpop.eup %6970  ;;  %6980 = vpow2.f32 %v5145_v34  ;;  %6823 = vmatpush3.msk.msra.mxu1 %vm1822_vm2, %v5288_v62 }
 0xa14   : > { %v5149_v1 = vmul.f32 1.442695, %v5137_v27  ;;  %v5160_v4 = vsel %vm1730_vm3, %v7776_v6, 0.0 }
 0xa15   : > { %5161 = vadd.xlane.f32.xlu1 %v5160_v4  ;;  %v5198_v8 = vpop.permute.xlu1 %5197  ;;  %v5129_v3 = vpop.xlane.xlu0 %5128 }
 0xa16   : > { %6982 = vpow2.f32 %v5149_v1  ;;  %v5139_v7 = vsub.f32 %v5100_v28, %v5129_v3 }
 0xa17   : > { %v7781_v37 = vpop.eup %6972 }
 0xa18   : > { %v5153_v38 = vmul.f32 1.442695, %v5139_v7  ;;  %v5166_v39 = vsel %vm1730_vm3, %v7781_v37, 0.0  ;;  %v6172_v7 = vld [vmem:[%s7869_s7] ss:$0 sm:$0xff] }
 0xa19   : > { %v5286_v36 = vpop.permute.xlu1 %5285  ;;  %5167 = vadd.xlane.f32.xlu1 %v5166_v39  ;;  %v5200_v41 = vpop.permute.xlu0 %5199 }
 0xa1a   : > { %6984 = vpow2.f32 %v5153_v38  ;;  %6815 = vmatprep.subr.msk.mxu0 %vm1822_vm2, %v5200_v41  ;;  %6824 = vmatprep.subr.mxu1 %v5286_v36 }
 0xa1b   : > { %v7786_v45 = vpop.eup %6974  ;;  %6816 = vmatpush3.msk.msra.mxu0 %vm1822_vm2, %v5200_v41  ;;  %6825 = vmatpush3.msra.mxu1 %v5286_v36 }
 0xa1c   : > { %v6977_v43 = vpop.eup %6976  ;;  %6817 = vmatprep.subr.mxu0 %v5198_v8  ;;  %v5172_v42 = vsel %vm1730_vm3, %v7786_v45, 0.0 }
 0xa1d   : > { %v5464_v49 = vpop.permute.xlu1 %5463  ;;  %5173 = vadd.xlane.f32.xlu1 %v5172_v42  ;;  %v5157_v50 = vsel %vm1726_vm4, %v6977_v43, 0.0  ;;  %6818 = vmatpush3.msra.mxu0 %v5198_v8  ;;  %v5376_v51 = vpop.permute.xlu0 %5375 }
 0xa1e   : > { %5158 = vadd.xlane.f32.xlu0 %v5157_v50  ;;  %6829 = vmatprep.subr.msk.mxu0 %vm1822_vm2, %v5376_v51 }
 0xa1f   : > { %v6979_v2 = vpop.eup %6978  ;;  %6836 = vmatprep.subr.msk.mxu1 %vm1822_vm2, %v5464_v49 }
 0xa20   : > { %v6981_v9 = vpop.eup %6980  ;;  %v5178_v20 = vsel %vm1730_vm3, %v6979_v2, 0.0 }
 0xa21   : > { %5179 = vadd.xlane.f32.xlu1 %v5178_v20  ;;  %v5163_v0 = vsel %vm1726_vm4, %v6981_v9, 0.0 }
 0xa22   : > { %5164 = vadd.xlane.f32.xlu0 %v5163_v0 }
 0xa23   : > { %v6983_v26 = vpop.eup %6982 }
 0xa24   : > { %v5169_v23 = vsel %vm1726_vm4, %v6983_v26, 0.0 }
 0xa26   : > { %5170 = vadd.xlane.f32.xlu0 %v5169_v23 }
 0xa27   : > { %v6985_v10 = vpop.eup %6984 }
 0xa28   : > { %v5175_v24 = vsel %vm1726_vm4, %v6985_v10, 0.0 }
 0xa2a   : > { %5176 = vadd.xlane.f32.xlu0 %v5175_v24 }
 0xa32   : > { %5461 = vrot.lane.b32.xlu1 %v7278_v58, %s7012_s29 }
 0xa40   : > { %5373 = vrot.lane.b32.xlu0 %v7280_v59, %s7012_s29 }
 0xa9e   : > { %v5162_v11 = vpop.xlane.xlu1 %5161 }
 0xa9f   : > { %6986 = vrcp.f32 %v5162_v11 }
 0xaa2   : > { %v5168_v29 = vpop.xlane.xlu1 %5167 }
 0xaa6   : > { %v5174_v22 = vpop.xlane.xlu1 %5173 }
 0xaa7   : > { %v5159_v19 = vpop.xlane.xlu0 %5158 }
 0xaa8   : > { %6988 = vrcp.f32 %v5159_v19 }
 0xaa9   : > { %6990 = vrcp.f32 %v5168_v29 }
 0xaaa   : > { %v5180_v28 = vpop.xlane.xlu1 %5179 }
 0xaab   : > { %v5165_v30 = vpop.xlane.xlu0 %5164 }
 0xaac   : > { %6992 = vrcp.f32 %v5165_v30  ;;  %v6987_v13 = vpop.eup %6986 }
 0xaad   : > { %6994 = vrcp.f32 %v5174_v22  ;;  %v5190_v59 = vmul.f32 %v6987_v13, %v7776_v6 }
 0xaae   : > { %v5462_v18 = vpop.permute.xlu1 %5461 }
 0xaaf   : > { %v5171_v25 = vpop.xlane.xlu0 %5170 }
 0xab0   : > { %6996 = vrcp.f32 %v5171_v25 }
 0xab1   : > { %6998 = vrcp.f32 %v5180_v28 }
 0xab3   : > { %v5177_v33 = vpop.xlane.xlu0 %5176 }
 0xab4   : > { %7000 = vrcp.f32 %v5177_v33 }
 0xab5   : > { %v6989_v58 = vpop.eup %6988 }
 0xab6   : > { %v5189_v32 = vmul.f32 %v6989_v58, %v6977_v43  ;;  %v6991_v12 = vpop.eup %6990 }
 0xab7   : > { %v5374_v54 = vpop.permute.xlu0 %5373  ;;  %v5192_v53 = vmul.f32 %v6991_v12, %v7781_v37 }
 0xab8   : > { %6819 = vmatprep.mubr.msk.f32.mxu0 %vm1726_vm4, %v5189_v32 }
 0xab9   : > { %v6993_v15 = vpop.eup %6992  ;;  %6820 = vmatmul.mubr.msk.f32.vlgmr.msra.gmra.mxu0 %vm1726_vm4, %v5190_v59 }
 0xaba   : > { %6830 = vmatpush3.msk.msra.mxu0 %vm1822_vm2, %v5376_v51  ;;  %v5191_v14 = vmul.f32 %v6993_v15, %v6981_v9  ;;  %v6995_v17 = vpop.eup %6994 }
 0xabb   : > { %6831 = vmatprep.subr.mxu0 %v5374_v54  ;;  %v5194_v57 = vmul.f32 %v6995_v17, %v7786_v45 }
 0xabc   : > { %6832 = vmatpush3.msra.mxu0 %v5374_v54  ;;  %6826 = vmatprep.mubr.msk.f32.mxu1 %vm1726_vm4, %v5191_v14 }
 0xabd   : > { %v6997_v55 = vpop.eup %6996  ;;  %6827 = vmatmul.mubr.msk.f32.vlgmr.msra.gmra.mxu1 %vm1726_vm4, %v5192_v53  ;;  %6843 = vmatprep.subr.mxu0 %v403_v56 }
 0xabe   : > { %6837 = vmatpush3.msk.msra.mxu1 %vm1822_vm2, %v5464_v49  ;;  %v5193_v21 = vmul.f32 %v6997_v55, %v6983_v26  ;;  %v6999_v60 = vpop.eup %6998 }
 0xabf   : > { %6838 = vmatprep.subr.mxu1 %v5462_v18  ;;  %v5196_v61 = vmul.f32 %v6999_v60, %v6979_v2 }
 0xac0   : > { %6839 = vmatpush3.msra.mxu1 %v5462_v18  ;;  %6833 = vmatprep.mubr.msk.f32.mxu0 %vm1726_vm4, %v5193_v21 }
 0xac1   : > { %v7001_v16 = vpop.eup %7000  ;;  %6834 = vmatmul.mubr.msk.f32.vlgmr.msra.gmra.mxu0 %vm1726_vm4, %v5194_v57  ;;  %6848 = vmatprep.subr.mxu1 %v403_v56 }
 0xac2   : > { %v5195_v52 = vmul.f32 %v7001_v16, %v6985_v10  ;;  %6844 = vmatpush3.msra.mxu0 %v403_v56 }
 0xac3   : > { %6853 = vmatprep.subr.mxu0 %v403_v56 }
 0xac4   : > { %6840 = vmatprep.mubr.msk.f32.mxu1 %vm1726_vm4, %v5195_v52 }
 0xac5   : > { %6841 = vmatmul.mubr.msk.f32.vlgmr.msra.gmra.mxu1 %vm1726_vm4, %v5196_v61 }
 0xac6   : > { %6849 = vmatpush3.msra.mxu1 %v403_v56 }
 0xac7   : > { %6858 = vmatprep.subr.mxu1 %v403_v56 }
 0xb79   : > { %v6821_v34 = vpop.f32.mrf.mxu0 }
 0xb7b   : > { %v5276_v62 = vpop.f32.mrf.mxu0 }
 0xb7c   : > { %6845 = vmatprep.mubr.msk.f32.mxu0 %vm1377_vm1, %v5276_v62 }
 0xb7d   : > { %v6828_v63 = vpop.f32.mrf.mxu1  ;;  %6846 = vmatmul.mubr.msk.f32.vlgmr.msra.gmra.mxu0 %vm1377_vm1, %v6821_v34 }
 0xb7e   : > { %6854 = vmatpush3.msra.mxu0 %v403_v56 }
 0xb7f   : > { %v5364_v27 = vpop.f32.mrf.mxu1 }
 0xb80   : > { %6850 = vmatprep.mubr.msk.f32.mxu1 %vm1377_vm1, %v5364_v27 }
 0xb81   : > { %v6835_v6 = vpop.f32.mrf.mxu0  ;;  %6851 = vmatmul.mubr.msk.f32.vlgmr.msra.gmra.mxu1 %vm1377_vm1, %v6828_v63 }
 0xb82   : > { %6859 = vmatpush3.msra.mxu1 %v403_v56 }
 0xb83   : > { %v5452_v1 = vpop.f32.mrf.mxu0 }
 0xb84   : > { %6855 = vmatprep.mubr.msk.f32.mxu0 %vm1377_vm1, %v5452_v1 }
 0xb85   : > { %v6842_v4 = vpop.f32.mrf.mxu1  ;;  %6856 = vmatmul.mubr.msk.f32.vlgmr.msra.gmra.mxu0 %vm1377_vm1, %v6835_v6 }
 0xb87   : > { %v5540_v8 = vpop.f32.mrf.mxu1 }
 0xb88   : > { %6860 = vmatprep.mubr.msk.f32.mxu1 %vm1377_vm1, %v5540_v8 }
 0xb89   : > { %6861 = vmatmul.mubr.msk.f32.vlgmr.msra.gmra.mxu1 %vm1377_vm1, %v6842_v4 }
 0xc3d   : > { %v6847_v3 = vpop.f32.mrf.mxu0 }
 0xc3e   : > { %v5874_v37 = vadd.f32 %v6847_v3, %v7732_v40 }
 0xc3f   : > { %v5621_v38 = vpop.f32.mrf.mxu0 }
 0xc40   : > { %v5889_v39 = vadd.f32 %v6172_v7, %v5874_v37  ;;  %v5873_v36 = vadd.f32 %v5621_v38, %v7735_v44 }
 0xc41   : > { %v6852_v41 = vpop.f32.mrf.mxu1 }
 0xc42   : > { %5898 = vst.msk [vmem:[%s7834_s17 + $0x8] sm:$0xf] %vm5897_vm5, %v5889_v39  ;;  %v5888_v45 = vadd.f32 %v6172_v7, %v5873_v36  ;;  %v5876_v40 = vadd.f32 %v6852_v41, %v7738_v46 }
 0xc43   : > { %v5702_v43 = vpop.f32.mrf.mxu1 }
 0xc44   : > { %5896 = vst.msk [vmem:[%s7834_s17] sm:$0xff] %vm404_vm0, %v5888_v45  ;;  %v5891_v42 = vadd.f32 %v6172_v7, %v5876_v40  ;;  %v5875_v49 = vadd.f32 %v5702_v43, %v7741_v47 }
 0xc45   : > { %v6857_v50 = vpop.f32.mrf.mxu0 }
 0xc46   : > { %5900 = vst.msk [vmem:[%s7834_s17 + $0x18] sm:$0xf] %vm5897_vm5, %v5891_v42  ;;  %v5890_v51 = vadd.f32 %v6172_v7, %v5875_v49  ;;  %v5878_v44 = vadd.f32 %v6857_v50, %v7744_v48 }
 0xc47   : > { %v5783_v2 = vpop.f32.mrf.mxu0 }
 0xc48   : > { %5899 = vst.msk [vmem:[%s7834_s17 + $0x10] sm:$0xff] %vm404_vm0, %v5890_v51  ;;  %v5893_v9 = vadd.f32 %v6172_v7, %v5878_v44  ;;  %v5877_v46 = vadd.f32 %v5783_v2, %v7747_v5 }
 0xc49   : > { %v6862_v20 = vpop.f32.mrf.mxu1 }
 0xc4a   : > { %5902 = vst.msk [vmem:[%s7834_s17 + $0x28] sm:$0xf] %vm5897_vm5, %v5893_v9  ;;  %v5892_v0 = vadd.f32 %v6172_v7, %v5877_v46  ;;  %v5880_v47 = vadd.f32 %v6862_v20, %v7750_v31 }
 0xc4b   : > { %v5864_v26 = vpop.f32.mrf.mxu1 }
 0xc4c   : > { %5901 = vst.msk [vmem:[%s7834_s17 + $0x20] sm:$0xff] %vm404_vm0, %v5892_v0  ;;  %v5895_v23 = vadd.f32 %v6172_v7, %v5880_v47  ;;  %v5879_v10 = vadd.f32 %v5864_v26, %v7753_v35 }
 0xc4e   : > { %5904 = vst.msk [vmem:[%s7834_s17 + $0x38] sm:$0xf] %vm5897_vm5, %v5895_v23  ;;  %v5894_v48 = vadd.f32 %v6172_v7, %v5879_v10 }
 0xc50   : > { %5903 = vst.msk [vmem:[%s7834_s17 + $0x30] sm:$0xff] %vm404_vm0, %v5894_v48 }
 0xc51 PF: > { %s18_s27 = sadd.s32 1, %s7008_s27  }
 0xc52   : > { %p15_p4 = scmp.ge.s32.totalorder %s18_s27, 4  }
 0xc54   :  { %17 = sbr.rel (!%p15_p4) target bundleno = 1 (0x1), region = 88 }

</bundles_post_ra>
